<compile_context>
chip_gen: v7x
topology: tpu7x:2x2x1
jax: 0.10.0
libtpu: 0.0.40
codegen_flags: <defaults>
</compile_context>

<pallas_src>
import math
import jax
import jax.numpy as jnp
from jax.experimental import pallas as pl
from jax.experimental.pallas import tpu as pltpu

B      = 32     # number of graphs in the batch
N      = 8      # nodes per graph
FIN    = 16     # in_features
FOUT   = 32     # out_features
HEADS  = 2      # num_heads
NEG_SLOPE = 0.2 # LeakyReLU negative slope
GRAPHS_PER_BLOCK = 16   # 16 graphs * 8 nodes = 128 MXU rows per grid step


def gat_kernel(x_ref, adj_ref, w_ref, a_ref, bias_ref, out_ref):
    gb = adj_ref.shape[0]                       # graphs in this block (static)

    # h = X @ W for all gb*N nodes at once: [gb*N, FIN] @ [FIN, H*FOUT]  (MXU)
    h2 = jnp.dot(x_ref[...], w_ref[...], preferred_element_type=jnp.float32)

    # All per-head attention coefficients in ONE matmul against the
    # block-structured a-matrix: c2[:, h] = h_h @ a_i[h],  c2[:, H+h] = h_h @ a_j[h]
    c2 = jnp.dot(h2, a_ref[...], preferred_element_type=jnp.float32)   # [gb*N, 2H]

    adj = adj_ref[...]                          # [gb, N, N]
    h3 = h2.reshape(gb, N, HEADS * FOUT)        # sublane-only split, lanes unchanged
    c3 = c2.reshape(gb, N, 2 * HEADS)

    ones_col = jnp.ones((gb, N, 1), jnp.float32)   # hoisted out of the head loop

    outs = []
    for head in range(HEADS):                   # unrolled at trace time (HEADS == 2)
        ci = c3[:, :, head:head + 1]                      # [gb, N, 1]  = ci[g, i]
        cj = c3[:, :, HEADS + head:HEADS + head + 1]      # [gb, N, 1]  = cj[g, j]

        # cj_row[g, i, j] = cj[g, j]: rank-1 batched MXU matmul instead of a
        # sublane->lane transpose.
        cj_row = jnp.einsum('gik,gjk->gij', ones_col, cj,
                            preferred_element_type=jnp.float32)        # [gb, N, N]
        coeff = ci + cj_row                     # coeff[g, i, j] = ci[g,i] + cj[g,j]

        # LeakyReLU
        e = jnp.where(coeff >= 0, coeff, NEG_SLOPE * coeff)

        # attention = softmax(e * adj, axis=j) * adj   (module's masking scheme)
        att = e * adj
        att = att - jnp.max(att, axis=2, keepdims=True)
        p = jnp.exp(att)
        att = p / jnp.sum(p, axis=2, keepdims=True)
        att = att * adj

        hh = h3[:, :, head * FOUT:(head + 1) * FOUT]      # [gb, N, FOUT]
        # h'[g] = att[g] @ h_head[g]   (batched MXU matmul)
        outs.append(jnp.einsum('gij,gjf->gif', att, hh,
                               preferred_element_type=jnp.float32))

    # Heads concatenated (average=False); one lane-dense [gb*N, H*FOUT] store,
    # bias added once outside the head loop.
    out = jnp.concatenate(outs, axis=-1).reshape(gb * N, HEADS * FOUT)
    out_ref[...] = out + bias_ref[...]


def graph_attention(x, adj, W, a_i, a_j, bias, *, graphs_per_block=GRAPHS_PER_BLOCK):
    """x: [B, N, FIN], adj: [B, N, N], W: [FIN, H*FOUT],
    a_i/a_j: [H, FOUT], bias: [1, H*FOUT]  ->  [B, N, H*FOUT]."""
    batch = x.shape[0]
    gb = graphs_per_block
    assert batch % gb == 0

    # Block-structured attention-vector matrix: one MXU dot gives all ci/cj.
    A = jnp.zeros((HEADS * FOUT, 2 * HEADS), dtype=jnp.float32)
    for h in range(HEADS):
        A = A.at[h * FOUT:(h + 1) * FOUT, h].set(a_i[h])
        A = A.at[h * FOUT:(h + 1) * FOUT, HEADS + h].set(a_j[h])

    x2 = x.reshape(batch * N, FIN)              # node-major, features on lanes

    out2 = pl.pallas_call(
        gat_kernel,
        out_shape=jax.ShapeDtypeStruct((batch * N, HEADS * FOUT), jnp.float32),
        grid_spec=pltpu.PrefetchScalarGridSpec(
            num_scalar_prefetch=0,
            grid=(batch // gb,),
            in_specs=[
                pl.BlockSpec((gb * N, FIN), lambda b: (b, 0)),          # x (flattened)
                pl.BlockSpec((gb, N, N), lambda b: (b, 0, 0)),          # adj
                pl.BlockSpec((FIN, HEADS * FOUT), lambda b: (0, 0)),    # W (revisited)
                pl.BlockSpec((HEADS * FOUT, 2 * HEADS), lambda b: (0, 0)),  # A
                pl.BlockSpec((1, HEADS * FOUT), lambda b: (0, 0)),      # bias
            ],
            out_specs=pl.BlockSpec((gb * N, HEADS * FOUT), lambda b: (b, 0)),
        ),
        compiler_params=pltpu.CompilerParams(
            dimension_semantics=("parallel",)),  # shard graph blocks on v7x's 2 TCs
    )(x2, adj, W, A, bias)

    return out2.reshape(batch, N, HEADS * FOUT)


def reference(x, adj, W, a_i, a_j, bias):
    """Pure-JAX reference mirroring the PyTorch forward (eval mode, dropout=0)."""
    batch = x.shape[0]
    h = (x.reshape(batch * N, FIN) @ W).reshape(batch, N, HEADS, FOUT)
    outs = []
    for head in range(HEADS):
        hh = h[:, :, head, :]                              # [B, N, FOUT]
        ci = hh @ a_i[head]                                # [B, N]
        cj = hh @ a_j[head]                                # [B, N]
        coeff = ci[:, :, None] + cj[:, None, :]            # [B, N, N]
        e = jnp.where(coeff >= 0, coeff, NEG_SLOPE * coeff)
        att = e * adj
        att = jax.nn.softmax(att, axis=2)
        att = att * adj
        outs.append(jnp.einsum('bij,bjf->bif', att, hh))
    return jnp.concatenate(outs, axis=-1) + bias[0]


if __name__ == "__main__":
    key = jax.random.PRNGKey(0)
    k_x, k_adj, k_w, k_ai, k_aj = jax.random.split(key, 5)

    gain = math.sqrt(2.0)  # calculate_gain('relu')
    std_w = gain * math.sqrt(2.0 / (FIN + HEADS * FOUT))
    std_a = gain * math.sqrt(2.0 / (FOUT + 1))

    x = jax.random.normal(k_x, (B, N, FIN), dtype=jnp.float32)
    # random symmetric 0/1 adjacency per graph
    a_rand = jax.random.bernoulli(k_adj, 0.5, (B, N, N)).astype(jnp.float32)
    adj = jnp.maximum(a_rand, jnp.swapaxes(a_rand, 1, 2))

    W = std_w * jax.random.normal(k_w, (FIN, HEADS * FOUT), dtype=jnp.float32)
    a_i = std_a * jax.random.normal(k_ai, (HEADS, FOUT), dtype=jnp.float32)
    a_j = std_a * jax.random.normal(k_aj, (HEADS, FOUT), dtype=jnp.float32)
    bias = jnp.zeros((1, HEADS * FOUT), dtype=jnp.float32)  # zero-init bias

    out = graph_attention(x, adj, W, a_i, a_j, bias)
    out = jax.block_until_ready(out)

    ref = reference(x, adj, W, a_i, a_j, bias)
    assert out.shape == (B, N, HEADS * FOUT)
    err = float(jnp.max(jnp.abs(out - ref)))
    assert jnp.allclose(out, ref, atol=1e-4, rtol=1e-4), err

    print("KERNEL_OK")
</pallas_src>

<mosaic_0001>
module attributes {stable_mosaic.version = 11 : i64} {
  func.func @gat_kernel(%arg0: i32, %arg1: memref<128x16xf32, #tpu.memory_space<vmem>>, %arg2: memref<16x8x8xf32, #tpu.memory_space<vmem>>, %arg3: memref<16x64xf32, #tpu.memory_space<vmem>>, %arg4: memref<64x4xf32, #tpu.memory_space<vmem>>, %arg5: memref<1x64xf32, #tpu.memory_space<vmem>>, %arg6: memref<128x64xf32, #tpu.memory_space<vmem>>) attributes {dimension_semantics = [#tpu.dimension_semantics<parallel>], iteration_bounds = array<i64: 2>, scalar_prefetch = 0 : i64, scratch_operands = 0 : i64, tpu.core_type = #tpu.core_type<tc>, window_params = [{transform_indices = @transform_0, window_bounds = array<i64: 128, 16>}, {transform_indices = @transform_1, window_bounds = array<i64: 16, 8, 8>}, {pipeline_mode = #tpu.pipeline_mode<synchronous>, transform_indices = @transform_2, window_bounds = array<i64: 16, 64>}, {pipeline_mode = #tpu.pipeline_mode<synchronous>, transform_indices = @transform_3, window_bounds = array<i64: 64, 4>}, {pipeline_mode = #tpu.pipeline_mode<synchronous>, transform_indices = @transform_4, window_bounds = array<i64: 1, 64>}, {transform_indices = @transform_5, window_bounds = array<i64: 128, 64>}]} {
    %c0 = arith.constant 0 : index
    %c0_0 = arith.constant 0 : index
    %0 = vector.load %arg1[%c0, %c0_0] : memref<128x16xf32, #tpu.memory_space<vmem>>, vector<128x16xf32>
    %c0_1 = arith.constant 0 : index
    %c0_2 = arith.constant 0 : index
    %1 = vector.load %arg3[%c0_1, %c0_2] : memref<16x64xf32, #tpu.memory_space<vmem>>, vector<16x64xf32>
    %cst = arith.constant dense<0.000000e+00> : vector<128x64xf32>
    %2 = tpu.matmul %0, %1, %cst {dimension_numbers = #tpu.dot_dimension_numbers<[1], [0], [0], [1], [0, 0, 1, 1], [], []>} : vector<128x16xf32>, vector<16x64xf32>, vector<128x64xf32> -> vector<128x64xf32>
    %c0_3 = arith.constant 0 : index
    %c0_4 = arith.constant 0 : index
    %3 = vector.load %arg4[%c0_3, %c0_4] : memref<64x4xf32, #tpu.memory_space<vmem>>, vector<64x4xf32>
    %cst_5 = arith.constant dense<0.000000e+00> : vector<128x4xf32>
    %4 = tpu.matmul %2, %3, %cst_5 {dimension_numbers = #tpu.dot_dimension_numbers<[1], [0], [0], [1], [0, 0, 1, 1], [], []>} : vector<128x64xf32>, vector<64x4xf32>, vector<128x4xf32> -> vector<128x4xf32>
    %c0_6 = arith.constant 0 : index
    %c0_7 = arith.constant 0 : index
    %c0_8 = arith.constant 0 : index
    %5 = vector.load %arg2[%c0_6, %c0_7, %c0_8] : memref<16x8x8xf32, #tpu.memory_space<vmem>>, vector<16x8x8xf32>
    %6 = vector.shape_cast %2 : vector<128x64xf32> to vector<16x8x64xf32>
    %7 = vector.shape_cast %4 : vector<128x4xf32> to vector<16x8x4xf32>
    %cst_9 = arith.constant 1.000000e+00 : f32
    %8 = vector.broadcast %cst_9 : f32 to vector<16x8x1xf32>
    %9 = vector.extract_strided_slice %7 {offsets = [0, 0, 0], sizes = [16, 8, 1], strides = [1, 1, 1]} : vector<16x8x4xf32> to vector<16x8x1xf32>
    %10 = vector.extract_strided_slice %7 {offsets = [0, 0, 2], sizes = [16, 8, 1], strides = [1, 1, 1]} : vector<16x8x4xf32> to vector<16x8x1xf32>
    "tpu.trace_start"() <{level = 10 : i32, message = "gik,gjk->gij"}> : () -> ()
    %cst_10 = arith.constant dense<0.000000e+00> : vector<16x8x8xf32>
    %11 = tpu.matmul %8, %10, %cst_10 {dimension_numbers = #tpu.dot_dimension_numbers<[2], [2], [1], [1], [0, 0, 0, 1, 1, 1], [0], [0]>} : vector<16x8x1xf32>, vector<16x8x1xf32>, vector<16x8x8xf32> -> vector<16x8x8xf32>
    "tpu.trace_stop"() : () -> ()
    %12 = vector.broadcast %9 : vector<16x8x1xf32> to vector<16x8x8xf32>
    %13 = arith.addf %12, %11 : vector<16x8x8xf32>
    %cst_11 = arith.constant 0.000000e+00 : f32
    %14 = vector.broadcast %cst_11 : f32 to vector<16x8x8xf32>
    %15 = arith.cmpf oge, %13, %14 : vector<16x8x8xf32>
    %cst_12 = arith.constant 2.000000e-01 : f32
    %16 = vector.broadcast %cst_12 : f32 to vector<16x8x8xf32>
    %17 = arith.mulf %16, %13 : vector<16x8x8xf32>
    %18 = arith.select %15, %13, %17 : vector<16x8x8xi1>, vector<16x8x8xf32>
    %19 = arith.mulf %18, %5 : vector<16x8x8xf32>
    %cst_13 = arith.constant dense<0xFF800000> : vector<16x8xf32>
    %20 = vector.multi_reduction <maximumf>, %19, %cst_13 [2] : vector<16x8x8xf32> to vector<16x8xf32>
    %21 = vector.shape_cast %20 : vector<16x8xf32> to vector<16x8x1xf32>
    %22 = vector.broadcast %21 : vector<16x8x1xf32> to vector<16x8x8xf32>
    %23 = arith.subf %19, %22 : vector<16x8x8xf32>
    %24 = math.exp %23 : vector<16x8x8xf32>
    %cst_14 = arith.constant dense<0.000000e+00> : vector<16x8xf32>
    %25 = vector.multi_reduction <add>, %24, %cst_14 [2] : vector<16x8x8xf32> to vector<16x8xf32>
    %26 = vector.shape_cast %25 : vector<16x8xf32> to vector<16x8x1xf32>
    %27 = vector.broadcast %26 : vector<16x8x1xf32> to vector<16x8x8xf32>
    %28 = arith.divf %24, %27 : vector<16x8x8xf32>
    %29 = arith.mulf %28, %5 : vector<16x8x8xf32>
    %30 = vector.extract_strided_slice %6 {offsets = [0, 0, 0], sizes = [16, 8, 32], strides = [1, 1, 1]} : vector<16x8x64xf32> to vector<16x8x32xf32>
    "tpu.trace_start"() <{level = 10 : i32, message = "gij,gjf->gif"}> : () -> ()
    %cst_15 = arith.constant dense<0.000000e+00> : vector<16x8x32xf32>
    %31 = tpu.matmul %29, %30, %cst_15 {dimension_numbers = #tpu.dot_dimension_numbers<[2], [1], [1], [2], [0, 0, 0, 1, 1, 2], [0], [0]>} : vector<16x8x8xf32>, vector<16x8x32xf32>, vector<16x8x32xf32> -> vector<16x8x32xf32>
    "tpu.trace_stop"() : () -> ()
    %32 = vector.extract_strided_slice %7 {offsets = [0, 0, 1], sizes = [16, 8, 1], strides = [1, 1, 1]} : vector<16x8x4xf32> to vector<16x8x1xf32>
    %33 = vector.extract_strided_slice %7 {offsets = [0, 0, 3], sizes = [16, 8, 1], strides = [1, 1, 1]} : vector<16x8x4xf32> to vector<16x8x1xf32>
    "tpu.trace_start"() <{level = 10 : i32, message = "gik,gjk->gij"}> : () -> ()
    %cst_16 = arith.constant dense<0.000000e+00> : vector<16x8x8xf32>
    %34 = tpu.matmul %8, %33, %cst_16 {dimension_numbers = #tpu.dot_dimension_numbers<[2], [2], [1], [1], [0, 0, 0, 1, 1, 1], [0], [0]>} : vector<16x8x1xf32>, vector<16x8x1xf32>, vector<16x8x8xf32> -> vector<16x8x8xf32>
    "tpu.trace_stop"() : () -> ()
    %35 = vector.broadcast %32 : vector<16x8x1xf32> to vector<16x8x8xf32>
    %36 = arith.addf %35, %34 : vector<16x8x8xf32>
    %cst_17 = arith.constant 0.000000e+00 : f32
    %37 = vector.broadcast %cst_17 : f32 to vector<16x8x8xf32>
    %38 = arith.cmpf oge, %36, %37 : vector<16x8x8xf32>
    %cst_18 = arith.constant 2.000000e-01 : f32
    %39 = vector.broadcast %cst_18 : f32 to vector<16x8x8xf32>
    %40 = arith.mulf %39, %36 : vector<16x8x8xf32>
    %41 = arith.select %38, %36, %40 : vector<16x8x8xi1>, vector<16x8x8xf32>
    %42 = arith.mulf %41, %5 : vector<16x8x8xf32>
    %cst_19 = arith.constant dense<0xFF800000> : vector<16x8xf32>
    %43 = vector.multi_reduction <maximumf>, %42, %cst_19 [2] : vector<16x8x8xf32> to vector<16x8xf32>
    %44 = vector.shape_cast %43 : vector<16x8xf32> to vector<16x8x1xf32>
    %45 = vector.broadcast %44 : vector<16x8x1xf32> to vector<16x8x8xf32>
    %46 = arith.subf %42, %45 : vector<16x8x8xf32>
    %47 = math.exp %46 : vector<16x8x8xf32>
    %cst_20 = arith.constant dense<0.000000e+00> : vector<16x8xf32>
    %48 = vector.multi_reduction <add>, %47, %cst_20 [2] : vector<16x8x8xf32> to vector<16x8xf32>
    %49 = vector.shape_cast %48 : vector<16x8xf32> to vector<16x8x1xf32>
    %50 = vector.broadcast %49 : vector<16x8x1xf32> to vector<16x8x8xf32>
    %51 = arith.divf %47, %50 : vector<16x8x8xf32>
    %52 = arith.mulf %51, %5 : vector<16x8x8xf32>
    %53 = vector.extract_strided_slice %6 {offsets = [0, 0, 32], sizes = [16, 8, 32], strides = [1, 1, 1]} : vector<16x8x64xf32> to vector<16x8x32xf32>
    "tpu.trace_start"() <{level = 10 : i32, message = "gij,gjf->gif"}> : () -> ()
    %cst_21 = arith.constant dense<0.000000e+00> : vector<16x8x32xf32>
    %54 = tpu.matmul %52, %53, %cst_21 {dimension_numbers = #tpu.dot_dimension_numbers<[2], [1], [1], [2], [0, 0, 0, 1, 1, 2], [0], [0]>} : vector<16x8x8xf32>, vector<16x8x32xf32>, vector<16x8x32xf32> -> vector<16x8x32xf32>
    "tpu.trace_stop"() : () -> ()
    %55 = tpu.concatenate %31, %54 in 2 : vector<16x8x32xf32>, vector<16x8x32xf32> -> vector<16x8x64xf32>
    %56 = vector.shape_cast %55 : vector<16x8x64xf32> to vector<128x64xf32>
    %c0_22 = arith.constant 0 : index
    %c0_23 = arith.constant 0 : index
    %57 = vector.load %arg5[%c0_22, %c0_23] : memref<1x64xf32, #tpu.memory_space<vmem>>, vector<1x64xf32>
    %58 = vector.broadcast %57 : vector<1x64xf32> to vector<128x64xf32>
    %59 = arith.addf %56, %58 : vector<128x64xf32>
    %c0_24 = arith.constant 0 : index
    %c0_25 = arith.constant 0 : index
    %60 = vector.load %arg6[%c0_24, %c0_25] : memref<128x64xf32, #tpu.memory_space<vmem>>, vector<128x64xf32>
    tpu.vector_store %arg6[%c0_24, %c0_25], %59 {strides = array<i32>} : memref<128x64xf32, #tpu.memory_space<vmem>>, vector<128x64xf32>,
    return
  }
  func.func @transform_0(%arg0: i32) -> (i32, i32) {
    %c0_i32 = arith.constant 0 : i32
    %c0_i32_0 = arith.constant 0 : i32
    return %arg0, %c0_i32 : i32, i32
  }
  func.func @transform_1(%arg0: i32) -> (i32, i32, i32) {
    %c0_i32 = arith.constant 0 : i32
    %c0_i32_0 = arith.constant 0 : i32
    %c0_i32_1 = arith.constant 0 : i32
    return %arg0, %c0_i32, %c0_i32_0 : i32, i32, i32
  }
  func.func @transform_2(%arg0: i32) -> (i32, i32) {
    %c0_i32 = arith.constant 0 : i32
    %c0_i32_0 = arith.constant 0 : i32
    %c0_i32_1 = arith.constant 0 : i32
    return %c0_i32, %c0_i32_0 : i32, i32
  }
  func.func @transform_3(%arg0: i32) -> (i32, i32) {
    %c0_i32 = arith.constant 0 : i32
    %c0_i32_0 = arith.constant 0 : i32
    %c0_i32_1 = arith.constant 0 : i32
    return %c0_i32, %c0_i32_0 : i32, i32
  }
  func.func @transform_4(%arg0: i32) -> (i32, i32) {
    %c0_i32 = arith.constant 0 : i32
    %c0_i32_0 = arith.constant 0 : i32
    %c0_i32_1 = arith.constant 0 : i32
    return %c0_i32, %c0_i32_0 : i32, i32
  }
  func.func @transform_5(%arg0: i32) -> (i32, i32) {
    %c0_i32 = arith.constant 0 : i32
    %c0_i32_0 = arith.constant 0 : i32
    return %arg0, %c0_i32 : i32, i32
  }
}

</mosaic_0001>

<bundles_post_ra>
// kernel: tpu_custom_call.1
= control target key start
LH: loop header
LB: loop body
LE: loop exit
PB: predicated region body
PF: predicated region fallthrough
CT: control target
= control target key end

     0   :  { %s7245_s18 = smov 0   ;;  %s8601_s0 = inlined_call_operand.vmem [shape: f32[256,16], index: 0, kind: input, shape index: {}]   ;;  %s8602_s1 = inlined_call_operand.vmem [shape: f32[32,8,8], index: 1, kind: input, shape index: {}]   ;;  %s8603_s2 = inlined_call_operand.vmem [shape: f32[16,64], index: 2, kind: input, shape index: {}]   ;;  %s8604_s3 = inlined_call_operand.vmem [shape: f32[64,4], index: 3, kind: input, shape index: {}]   ;;  %s8605_s4 = inlined_call_operand.vmem [shape: f32[1,64], index: 4, kind: input, shape index: {}]   ;;  %s8606_s5 = inlined_call_operand.vmem [shape: f32[256,64], index: 5, kind: output, shape index: {}]  }
   0x1 LB: > { %s6313_s19 = sadd.s32 4294967295, %s7204_s18   ;;  %p6317_p0 = scmp.ge.s32.totalorder %s7204_s18, 1  ;;  %s7204_s18 = sphi %s7245_s18, %s15_s18  }
   0x2   : > { %p199_p1 = scmp.lt.s32.totalorder %s7204_s18, 3 }
   0x4   : > { %p200_p2 = pnand %p6317_p0, %p199_p1 }
   0x6   : > { %203 = sbr.rel (%p200_p2) target bundleno = 2087 (0x827), region = 40 }
   0xd   : > { %v266_v0 = vld [vmem:[%s8603_s2] sm:$0xff]  ;;  %v267_v1 = vld [vmem:[%s8603_s2 + $0x8] sm:$0xff]  ;;  %s6318_s24 = sshll.u32 %s6313_s19, 4  ;;  %v464_v5 = vld [vmem:[%s8604_s3 + $0x10] sm:$0xff]  ;;  %vm268_vm0 = vcmask 130048   ;;  %vm470_vm1 = vcmask 523264  }
   0xe   : > { %v462_v2 = vld [vmem:[%s8604_s3] sm:$0xff]  ;;  %v7013_v3 = vpack.c.bf16 %v267_v1, %v266_v0  ;;  %p233_p3 = scmp.lt.s32.totalorder %s6318_s24, 31  ;;  %v463_v4 = vld [vmem:[%s8604_s3 + $0x8] sm:$0xff]  ;;  %v465_v6 = vld [vmem:[%s8604_s3 + $0x18] sm:$0xff]  ;;  %v7206_v47 = vmov 0   ;;  %v8609_v48 = vmov 0.0  }
   0xf   : > { %v7017_v7 = vpack.c.bf16 %v463_v4, %v462_v2  ;;  %v7021_v8 = vpack.c.bf16 %v465_v6, %v464_v5  ;;  %v466_v9 = vld [vmem:[%s8604_s3 + $0x20] sm:$0xff]  ;;  %v467_v10 = vld [vmem:[%s8604_s3 + $0x28] sm:$0xff]  ;;  %v468_v12 = vld [vmem:[%s8604_s3 + $0x30] sm:$0xff]  ;;  %7050 = vset.pattern.permute.xlu0 %v7206_v47  ;;  %7051 = vset.pattern.permute.xlu1 %v7206_v47  ;;  %vm7208_vm2 = vmmov 0   ;;  %s7209_s21 = smov 126   ;;  %vm683_vm3 = vcmask 7168  }
  0x10   : > { %7014 = vmatprep.subr.bf16.mxu0 %v7013_v3  ;;  %s8682_s24 = smov (!%p233_p3, %s6318_s24), 31  ;;  %v7025_v11 = vpack.c.bf16 %v467_v10, %v466_v9  ;;  %v469_v13 = vld [vmem:[%s8604_s3 + $0x38] sm:$0xff]  ;;  %v8607_v2 = vmov 1.0   ;;  %vm2028_vm5 = vcmask 64512   ;;  %s7212_s25 = smov 125  }
  0x11   : > { %7016 = vmatpush3.bf16.msra.mxu0 %v7013_v3  ;;  %7018 = vmatprep.subr.bf16.mxu1 %v7017_v7  ;;  %s7277_s12 = sshll.u32 %s8682_s24, 3  ;;  %v7029_v18 = vpack.c.bf16 %v469_v13, %v468_v12  ;;  %s7213_s26 = smov 96  }
  0x12   : > { %7020 = vmatpush3.bf16.msra.mxu1 %v7017_v7  ;;  %s7283_s15 = scalar_lea.vmem %s8601_s0, %s7277_s12  ;;  %6693 = vmatprep.subr.mxu0 %v8609_v48  ;;  %s7561_s24 = scalar_lea.vmem %s8602_s1, %s7277_s12 }
  0x13   : > { %7022 = vmatprep.subr.bf16.mxu1 %v7021_v8  ;;  %v250_v14 = vld [vmem:[%s7283_s15] sm:$0xff]  ;;  %v251_v15 = vld [vmem:[%s7283_s15 + $0x8] sm:$0xff]  ;;  %v252_v16 = vld [vmem:[%s7283_s15 + $0x10] sm:$0xff]  ;;  %s7214_s27 = smov 32   ;;  %s8516_s7 = scalar_lea.vmem %s8606_s5, %s7277_s12 }
  0x14   : > { %6629 = vmatprep.mubr.msk.f32.mxu0 %vm268_vm0, %v250_v14  ;;  %v253_v17 = vld [vmem:[%s7283_s15 + $0x18] sm:$0xff]  ;;  %v254_v19 = vld [vmem:[%s7283_s15 + $0x20] sm:$0xff]  ;;  %v255_v20 = vld [vmem:[%s7283_s15 + $0x28] sm:$0xff] }
  0x15   : > { %6630 = vmatmul.mubr.msk.f32.vlgmr.msra.gmra.mrb[0].mxu0 %vm268_vm0, %v251_v15  ;;  %v256_v21 = vld [vmem:[%s7283_s15 + $0x30] sm:$0xff]  ;;  %v257_v22 = vld [vmem:[%s7283_s15 + $0x38] sm:$0xff]  ;;  %v258_v23 = vld [vmem:[%s7283_s15 + $0x40] sm:$0xff] }
  0x16   : > { %7024 = vmatpush3.bf16.msra.mxu1 %v7021_v8  ;;  %6632 = vmatprep.mubr.msk.f32.mxu0 %vm268_vm0, %v252_v16  ;;  %v259_v24 = vld [vmem:[%s7283_s15 + $0x48] sm:$0xff]  ;;  %v260_v25 = vld [vmem:[%s7283_s15 + $0x50] sm:$0xff]  ;;  %v261_v26 = vld [vmem:[%s7283_s15 + $0x58] sm:$0xff] }
  0x17   : > { %7026 = vmatprep.subr.bf16.mxu1 %v7025_v11  ;;  %v262_v27 = vld [vmem:[%s7283_s15 + $0x60] sm:$0xff]  ;;  %v263_v28 = vld [vmem:[%s7283_s15 + $0x68] sm:$0xff]  ;;  %v264_v29 = vld [vmem:[%s7283_s15 + $0x70] sm:$0xff] }
  0x18   : > { %v265_v30 = vld [vmem:[%s7283_s15 + $0x78] sm:$0xff] }
  0x19   : > { %6633 = vmatmul.mubr.msk.f32.gmra.mrb[2].mxu0 %vm268_vm0, %v253_v17 }
  0x1a   : > { %7028 = vmatpush3.bf16.msra.mxu1 %v7025_v11  ;;  %6635 = vmatprep.mubr.msk.f32.mxu0 %vm268_vm0, %v254_v19 }
  0x1b   : > { %7030 = vmatprep.subr.bf16.mxu1 %v7029_v18 }
  0x1d   : > { %6636 = vmatmul.mubr.msk.f32.gmra.mrb[4].mxu0 %vm268_vm0, %v255_v20 }
  0x1e   : > { %7032 = vmatpush3.bf16.msra.mxu1 %v7029_v18  ;;  %6638 = vmatprep.mubr.msk.f32.mxu0 %vm268_vm0, %v256_v21 }
  0x1f   : > { %6713 = vmatprep.subr.mxu1 %v8609_v48 }
  0x21   : > { %6639 = vmatmul.mubr.msk.f32.gmra.mrb[6].mxu0 %vm268_vm0, %v257_v22 }
  0x22   : > { %6641 = vmatprep.mubr.msk.f32.mxu0 %vm268_vm0, %v258_v23 }
  0x25   : > { %6642 = vmatmul.mubr.msk.f32.gmra.mrb[8].mxu0 %vm268_vm0, %v259_v24 }
  0x26   : > { %6644 = vmatprep.mubr.msk.f32.mxu0 %vm268_vm0, %v260_v25 }
  0x29   : > { %6645 = vmatmul.mubr.msk.f32.gmra.mrb[10].mxu0 %vm268_vm0, %v261_v26 }
  0x2a   : > { %6647 = vmatprep.mubr.msk.f32.mxu0 %vm268_vm0, %v262_v27  ;;  %v7564_v27 = vld [vmem:[%s7561_s24] sm:$0xff] }
  0x2d   : > { %6648 = vmatmul.mubr.msk.f32.gmra.mrb[12].mxu0 %vm268_vm0, %v263_v28 }
  0x2e   : > { %6650 = vmatprep.mubr.msk.f32.mxu0 %vm268_vm0, %v264_v29 }
  0x31   : > { %6651 = vmatmul.mubr.msk.f32.gmra.mrb[14].mxu0 %vm268_vm0, %v265_v30 }
  0x32   : > { %6695 = vmatprep.mubr.msk.f32.mxu0 %vm7208_vm2, %v8609_v48 }
  0xe8   : > { %v7323_v31 = vpop.f32.mrb[0].mxu0 }
  0xe9   : > { %v7325_v32 = vpop.f32.mrb[1].mxu0 }
  0xea   : > { %6669 = vmatprep.mubr.msk.f32.mxu1 %vm470_vm1, %v7325_v32 }
  0xeb   : > { %6670 = vmatmul.mubr.msk.f32.vlgmr.msra.gmra.mrb[0].mxu1 %vm470_vm1, %v7323_v31 }
  0xec   : > { %v7331_v33 = vpop.f32.mrb[2].mxu0 }
  0xed   : > { %v7333_v34 = vpop.f32.mrb[3].mxu0 }
  0xee   : > { %6672 = vmatprep.mubr.msk.f32.mxu1 %vm470_vm1, %v7333_v34 }
  0xef   : > { %6673 = vmatmul.mubr.msk.f32.gmra.mrb[2].mxu1 %vm470_vm1, %v7331_v33 }
  0xf0   : > { %v7339_v35 = vpop.f32.mrb[4].mxu0 }
  0xf1   : > { %v7341_v36 = vpop.f32.mrb[5].mxu0 }
  0xf2   : > { %6675 = vmatprep.mubr.msk.f32.mxu1 %vm470_vm1, %v7341_v36 }
  0xf3   : > { %6676 = vmatmul.mubr.msk.f32.gmra.mrb[4].mxu1 %vm470_vm1, %v7339_v35 }
  0xf4   : > { %v7347_v37 = vpop.f32.mrb[6].mxu0 }
  0xf5   : > { %8633 = vst [vmem:[#allocation2_spill] sm:$0xff] %v7347_v37  ;;  %v7349_v38 = vpop.f32.mrb[7].mxu0 }
  0xf6   : > { %6678 = vmatprep.mubr.msk.f32.mxu1 %vm470_vm1, %v7349_v38 }
  0xf7   : > { %6679 = vmatmul.mubr.msk.f32.gmra.mrb[6].mxu1 %vm470_vm1, %v7347_v37 }
  0xf8   : > { %v7355_v39 = vpop.f32.mrb[8].mxu0 }
  0xf9   : > { %8634 = vst [vmem:[#allocation3_spill] sm:$0xff] %v7355_v39  ;;  %v7357_v40 = vpop.f32.mrb[9].mxu0 }
  0xfa   : > { %6681 = vmatprep.mubr.msk.f32.mxu1 %vm470_vm1, %v7357_v40 }
  0xfb   : > { %6682 = vmatmul.mubr.msk.f32.gmra.mrb[8].mxu1 %vm470_vm1, %v7355_v39 }
  0xfc   : > { %v7363_v41 = vpop.f32.mrb[10].mxu0 }
  0xfd   : > { %8635 = vst [vmem:[#allocation4_spill] sm:$0xff] %v7363_v41  ;;  %v7365_v42 = vpop.f32.mrb[11].mxu0 }
  0xfe   : > { %8636 = vst [vmem:[#allocation5_spill] sm:$0xff] %v7365_v42  ;;  %6684 = vmatprep.mubr.msk.f32.mxu1 %vm470_vm1, %v7365_v42 }
  0xff   : > { %6685 = vmatmul.mubr.msk.f32.gmra.mrb[10].mxu1 %vm470_vm1, %v7363_v41 }
 0x100   : > { %v7371_v43 = vpop.f32.mrb[12].mxu0 }
 0x101   : > { %8637 = vst [vmem:[#allocation6_spill] sm:$0xff] %v7371_v43  ;;  %v7373_v44 = vpop.f32.mrb[13].mxu0 }
 0x102   : > { %8638 = vst [vmem:[#allocation7_spill] sm:$0xff] %v7373_v44  ;;  %6687 = vmatprep.mubr.msk.f32.mxu1 %vm470_vm1, %v7373_v44  ;;  %v7636_v44 = vld [vmem:[%s7561_s24 + $0x48] sm:$0xff] }
 0x103   : > { %6688 = vmatmul.mubr.msk.f32.gmra.mrb[12].mxu1 %vm470_vm1, %v7371_v43  ;;  %8644 = vst [vmem:[#allocation13_spill] sm:$0xff] %v7636_v44 }
 0x104   : > { %v7379_v45 = vpop.f32.mrb[14].mxu0 }
 0x105   : > { %8639 = vst [vmem:[#allocation8_spill] sm:$0xff] %v7379_v45  ;;  %v7381_v46 = vpop.f32.mrb[15].mxu0 }
 0x106   : > { %8640 = vst [vmem:[#allocation9_spill] sm:$0xff] %v7381_v46  ;;  %6690 = vmatprep.mubr.msk.f32.mxu1 %vm470_vm1, %v7381_v46 }
 0x107   : > { %6691 = vmatmul.mubr.msk.f32.gmra.mrb[14].mxu1 %vm470_vm1, %v7379_v45  ;;  %v7619_v45 = vld [vmem:[%s7561_s24 + $0x38] sm:$0xff] }
 0x108   : > { %6715 = vmatprep.mubr.msk.f32.mxu1 %vm7208_vm2, %v8609_v48  ;;  %8642 = vst [vmem:[#allocation11_spill] sm:$0xff] %v7619_v45 }
 0x1be   : > { %v7393_v49 = vpop.f32.mrb[0].mxu1 }
 0x1bf   : > { %v7395_v50 = vpop.f32.mrb[1].mxu1 }
 0x1c0   : > { %681 = vrot.lane.b32.xlu0 %v7395_v50, %s7209_s21 }
 0x1c2   : > { %v7398_v51 = vpop.f32.mrb[2].mxu1 }
 0x1c3   : > { %v7400_v52 = vpop.f32.mrb[3].mxu1 }
 0x1c4   : > { %760 = vrot.lane.b32.xlu0 %v7393_v49, %s7209_s21  ;;  %835 = vrot.lane.b32.xlu1 %v7400_v52, %s7209_s21 }
 0x1c6   : > { %v7404_v53 = vpop.f32.mrb[4].mxu1 }
 0x1c7   : > { %v7406_v54 = vpop.f32.mrb[5].mxu1 }
 0x1c8   : > { %910 = vrot.lane.b32.xlu1 %v7398_v51, %s7209_s21  ;;  %985 = vrot.lane.b32.xlu0 %v7406_v54, %s7209_s21 }
 0x1ca   : > { %v7410_v55 = vpop.f32.mrb[6].mxu1 }
 0x1cb   : > { %v7412_v56 = vpop.f32.mrb[7].mxu1 }
 0x1cc   : > { %1060 = vrot.lane.b32.xlu1 %v7404_v53, %s7209_s21  ;;  %1135 = vrot.lane.b32.xlu0 %v7412_v56, %s7209_s21 }
 0x1ce   : > { %v7416_v57 = vpop.f32.mrb[8].mxu1 }
 0x1cf   : > { %v7418_v58 = vpop.f32.mrb[9].mxu1 }
 0x1d0   : > { %1210 = vrot.lane.b32.xlu1 %v7410_v55, %s7209_s21  ;;  %1285 = vrot.lane.b32.xlu0 %v7418_v58, %s7209_s21 }
 0x1d2   : > { %v7422_v59 = vpop.f32.mrb[10].mxu1 }
 0x1d3   : > { %v7424_v60 = vpop.f32.mrb[11].mxu1 }
 0x1d4   : > { %1360 = vrot.lane.b32.xlu1 %v7416_v57, %s7209_s21  ;;  %1435 = vrot.lane.b32.xlu0 %v7424_v60, %s7209_s21 }
 0x1d6   : > { %v7428_v61 = vpop.f32.mrb[12].mxu1 }
 0x1d7   : > { %v7430_v62 = vpop.f32.mrb[13].mxu1 }
 0x1d8   : > { %1510 = vrot.lane.b32.xlu1 %v7422_v59, %s7209_s21  ;;  %1585 = vrot.lane.b32.xlu0 %v7430_v62, %s7209_s21 }
 0x1da   : > { %v7434_v63 = vpop.f32.mrb[14].mxu1 }
 0x1db   : > { %v7436_v0 = vpop.f32.mrb[15].mxu1 }
 0x1dc   : > { %1660 = vrot.lane.b32.xlu1 %v7428_v61, %s7209_s21  ;;  %1735 = vrot.lane.b32.xlu0 %v7436_v0, %s7209_s21 }
 0x1e0   : > { %1810 = vrot.lane.b32.xlu1 %v7434_v63, %s7209_s21  ;;  %1885 = vperm.xlu0 %7050, %v7395_v50  }
 0x1e4   : > { %1889 = vperm.xlu1 %7051, %v7393_v49   ;;  %1897 = vperm.xlu0 %7050, %v7398_v51  }
 0x1e8   : > { %1893 = vperm.xlu1 %7051, %v7400_v52   ;;  %1905 = vperm.xlu0 %7050, %v7404_v53  }
 0x1ec   : > { %1901 = vperm.xlu1 %7051, %v7406_v54   ;;  %1913 = vperm.xlu0 %7050, %v7410_v55  }
 0x1f0   : > { %1909 = vperm.xlu1 %7051, %v7412_v56   ;;  %1921 = vperm.xlu0 %7050, %v7416_v57  }
 0x1f4   : > { %1917 = vperm.xlu1 %7051, %v7418_v58   ;;  %1929 = vperm.xlu0 %7050, %v7422_v59  }
 0x1f8   : > { %1925 = vperm.xlu1 %7051, %v7424_v60   ;;  %1937 = vperm.xlu0 %7050, %v7428_v61  }
 0x1fc   : > { %1933 = vperm.xlu1 %7051, %v7430_v62   ;;  %1945 = vperm.xlu0 %7050, %v7434_v63  }
 0x200   : > { %1941 = vperm.xlu1 %7051, %v7436_v0  }
 0x232   : > { %v682_v1 = vpop.permute.xlu0 %681 }
 0x233   : > { %6694 = vmatpush3.xpose.msk.msra.mxu0 %vm683_vm3, %v682_v1 }
 0x234   : > { %6698 = vmatprep.subr.mxu0 %v8609_v48 }
 0x236   : > { %6696 = vmatmul.mubr.msk.f32.vlgmr.msra.gmra.mrb[16].mxu0 %vm683_vm3, %v8607_v2  ;;  %v761_v3 = vpop.permute.xlu0 %760  ;;  %v836_v4 = vpop.permute.xlu1 %835 }
 0x237   : > { %6699 = vmatpush3.xpose.msk.msra.mxu0 %vm683_vm3, %v761_v3  ;;  %6700 = vmatprep.mubr.msk.f32.mxu0 %vm7208_vm2, %v8609_v48 }
 0x238   : > { %6703 = vmatprep.subr.mxu0 %v8609_v48 }
 0x23a   : > { %6701 = vmatmul.mubr.msk.f32.vlgmr.msra.gmra.mrb[18].mxu0 %vm683_vm3, %v8607_v2  ;;  %v986_v5 = vpop.permute.xlu0 %985  ;;  %v911_v6 = vpop.permute.xlu1 %910 }
 0x23b   : > { %6704 = vmatpush3.xpose.msk.msra.mxu0 %vm683_vm3, %v836_v4  ;;  %6714 = vmatpush3.xpose.msk.msra.mxu1 %vm683_vm3, %v986_v5 }
 0x23c   : > { %6705 = vmatprep.mubr.msk.f32.mxu0 %vm7208_vm2, %v8609_v48  ;;  %6708 = vmatprep.subr.mxu0 %v8609_v48 }
 0x23d   : > { %6723 = vmatprep.subr.mxu1 %v8609_v48 }
 0x23e   : > { %6706 = vmatmul.mubr.msk.f32.vlgmr.msra.gmra.mrb[20].mxu0 %vm683_vm3, %v8607_v2  ;;  %v1136_v7 = vpop.permute.xlu0 %1135  ;;  %6716 = vmatmul.mubr.msk.f32.vlgmr.msra.gmra.mrb[16].mxu1 %vm683_vm3, %v8607_v2  ;;  %v1061_v8 = vpop.permute.xlu1 %1060 }
 0x23f   : > { %6709 = vmatpush3.xpose.msk.msra.mxu0 %vm683_vm3, %v911_v6  ;;  %6724 = vmatpush3.xpose.msk.msra.mxu1 %vm683_vm3, %v1136_v7  ;;  %v7570_v6 = vld [vmem:[%s7561_s24 + $0x8] sm:$0xff] }
 0x240   : > { %6710 = vmatprep.mubr.msk.f32.mxu0 %vm7208_vm2, %v8609_v48  ;;  %6725 = vmatprep.mubr.msk.f32.mxu1 %vm7208_vm2, %v8609_v48 }
 0x241   : > { %6718 = vmatprep.subr.mxu0 %v8609_v48  ;;  %6733 = vmatprep.subr.mxu1 %v8609_v48 }
 0x242   : > { %6711 = vmatmul.mubr.msk.f32.vlgmr.msra.gmra.mrb[22].mxu0 %vm683_vm3, %v8607_v2  ;;  %v1286_v9 = vpop.permute.xlu0 %1285  ;;  %6726 = vmatmul.mubr.msk.f32.vlgmr.msra.gmra.mrb[18].mxu1 %vm683_vm3, %v8607_v2  ;;  %v1211_v10 = vpop.permute.xlu1 %1210 }
 0x243   : > { %6719 = vmatpush3.xpose.msk.msra.mxu0 %vm683_vm3, %v1061_v8  ;;  %6734 = vmatpush3.xpose.msk.msra.mxu1 %vm683_vm3, %v1286_v9 }
 0x244   : > { %6720 = vmatprep.mubr.msk.f32.mxu0 %vm7208_vm2, %v8609_v48  ;;  %6735 = vmatprep.mubr.msk.f32.mxu1 %vm7208_vm2, %v8609_v48 }
 0x245   : > { %6728 = vmatprep.subr.mxu0 %v8609_v48  ;;  %6743 = vmatprep.subr.mxu1 %v8609_v48 }
 0x246   : > { %6721 = vmatmul.mubr.msk.f32.vlgmr.msra.gmra.mrb[24].mxu0 %vm683_vm3, %v8607_v2  ;;  %v1436_v11 = vpop.permute.xlu0 %1435  ;;  %6736 = vmatmul.mubr.msk.f32.vlgmr.msra.gmra.mrb[20].mxu1 %vm683_vm3, %v8607_v2  ;;  %v1361_v12 = vpop.permute.xlu1 %1360 }
 0x247   : > { %6729 = vmatpush3.xpose.msk.msra.mxu0 %vm683_vm3, %v1211_v10  ;;  %6744 = vmatpush3.xpose.msk.msra.mxu1 %vm683_vm3, %v1436_v11 }
 0x248   : > { %6730 = vmatprep.mubr.msk.f32.mxu0 %vm7208_vm2, %v8609_v48  ;;  %6745 = vmatprep.mubr.msk.f32.mxu1 %vm7208_vm2, %v8609_v48 }
 0x249   : > { %6738 = vmatprep.subr.mxu0 %v8609_v48  ;;  %6753 = vmatprep.subr.mxu1 %v8609_v48 }
 0x24a   : > { %6731 = vmatmul.mubr.msk.f32.vlgmr.msra.gmra.mrb[26].mxu0 %vm683_vm3, %v8607_v2  ;;  %v1586_v13 = vpop.permute.xlu0 %1585  ;;  %6746 = vmatmul.mubr.msk.f32.vlgmr.msra.gmra.mrb[22].mxu1 %vm683_vm3, %v8607_v2  ;;  %v1511_v14 = vpop.permute.xlu1 %1510 }
 0x24b   : > { %6739 = vmatpush3.xpose.msk.msra.mxu0 %vm683_vm3, %v1361_v12  ;;  %6754 = vmatpush3.xpose.msk.msra.mxu1 %vm683_vm3, %v1586_v13 }
 0x24c   : > { %6740 = vmatprep.mubr.msk.f32.mxu0 %vm7208_vm2, %v8609_v48  ;;  %6755 = vmatprep.mubr.msk.f32.mxu1 %vm7208_vm2, %v8609_v48 }
 0x24d   : > { %6748 = vmatprep.subr.mxu0 %v8609_v48  ;;  %6763 = vmatprep.subr.mxu1 %v8609_v48 }
 0x24e   : > { %6741 = vmatmul.mubr.msk.f32.vlgmr.msra.gmra.mrb[28].mxu0 %vm683_vm3, %v8607_v2  ;;  %6756 = vmatmul.mubr.msk.f32.vlgmr.msra.gmra.mrb[24].mxu1 %vm683_vm3, %v8607_v2  ;;  %v1736_v15 = vpop.permute.xlu0 %1735  ;;  %v1661_v16 = vpop.permute.xlu1 %1660 }
 0x24f   : > { %6749 = vmatpush3.xpose.msk.msra.mxu0 %vm683_vm3, %v1511_v14  ;;  %6764 = vmatpush3.xpose.msk.msra.mxu1 %vm683_vm3, %v1736_v15 }
 0x250   : > { %6750 = vmatprep.mubr.msk.f32.mxu0 %vm7208_vm2, %v8609_v48  ;;  %6765 = vmatprep.mubr.msk.f32.mxu1 %vm7208_vm2, %v8609_v48 }
 0x251   : > { %6758 = vmatprep.subr.mxu0 %v8609_v48  ;;  %6773 = vmatprep.subr.mxu1 %v8609_v48 }
 0x252   : > { %6751 = vmatmul.mubr.msk.f32.vlgmr.msra.gmra.mrb[30].mxu0 %vm683_vm3, %v8607_v2  ;;  %6766 = vmatmul.mubr.msk.f32.vlgmr.msra.gmra.mrb[26].mxu1 %vm683_vm3, %v8607_v2  ;;  %v1811_v17 = vpop.permute.xlu1 %1810 }
 0x253   : > { %6759 = vmatpush3.xpose.msk.msra.mxu0 %vm683_vm3, %v1661_v16  ;;  %6774 = vmatpush3.msra.mxu1 %v7325_v32  ;;  %v7578_v16 = vld [vmem:[%s7561_s24 + $0x10] sm:$0xff] }
 0x254   : > { %6760 = vmatprep.mubr.msk.f32.mxu0 %vm7208_vm2, %v8609_v48  ;;  %6768 = vmatprep.subr.mxu0 %v8609_v48 }
 0x255   : > { %6775 = vmatprep.mubr.msk.f32.mxu1 %vm7208_vm2, %v8609_v48  ;;  %6783 = vmatprep.subr.mxu1 %v8609_v48 }
 0x256   : > { %6761 = vmatmul.mubr.msk.f32.vlgmr.msra.gmra.mrb[32].mxu0 %vm683_vm3, %v8607_v2 }
 0x257   : > { %6769 = vmatpush3.xpose.msk.msra.mxu0 %vm683_vm3, %v1811_v17  ;;  %6770 = vmatprep.mubr.msk.f32.mxu0 %vm7208_vm2, %v8609_v48 }
 0x258   : > { %6778 = vmatprep.subr.mxu0 %v8609_v48 }
 0x25a   : > { %6771 = vmatmul.mubr.msk.f32.vlgmr.msra.gmra.mrb[34].mxu0 %vm683_vm3, %v8607_v2 }
 0x25b   : > { %6779 = vmatpush3.msra.mxu0 %v7323_v31  ;;  %6780 = vmatprep.mubr.msk.f32.mxu0 %vm7208_vm2, %v8609_v48 }
 0x25c   : > { %6788 = vmatprep.subr.mxu0 %v8609_v48 }
 0x25f   : > { %v1886_v19 = vpop.permute.xlu0 %1885 }
 0x263   : > { %v1890_v18 = vpop.permute.xlu1 %1889  ;;  %v1898_v21 = vpop.permute.xlu0 %1897 }
 0x267   : > { %v1894_v20 = vpop.permute.xlu1 %1893  ;;  %v1906_v28 = vpop.permute.xlu0 %1905 }
 0x26b   : > { %v1902_v22 = vpop.permute.xlu1 %1901  ;;  %v1914_v17 = vpop.permute.xlu0 %1913 }
 0x26f   : > { %v1910_v30 = vpop.permute.xlu1 %1909 }
 0x309   : > { %v755_v23 = vpop.f32.mrb[16].mxu0 }
 0x30a   : > { %v1948_v24 = vadd.f32 %v1886_v19, %v755_v23  ;;  %v6697_v25 = vpop.f32.mrb[17].mxu0 }
 0x30c   : > { %vm1964_vm4 = vcmp.ge.f32.partialorder %v1948_v24, 0.0  ;;  %v1980_v26 = vmul.f32 0.2, %v1948_v24 }
 0x30d   : > { %v830_v29 = vpop.f32.mrb[18].mxu0 }
 0x30e   : > { %v1949_v47 = vadd.f32 %v1890_v18, %v830_v29  ;;  %v6702_v1 = vpop.f32.mrb[19].mxu0  ;;  %v1996_v3 = vsel %vm1964_vm4, %v1948_v24, %v1980_v26  ;;  %v1918_v18 = vpop.permute.xlu1 %1917 }
 0x30f   : > { %v7567_v4 = vmul.f32 %v1996_v3, %v7564_v27  ;;  %v7583_v3 = vld [vmem:[%s7561_s24 + $0x20] sm:$0xff] }
 0x310   : > { %vm1965_vm6 = vcmp.ge.f32.partialorder %v1949_v47, 0.0  ;;  %v1981_v5 = vmul.f32 0.2, %v1949_v47 }
 0x311   : > { %v905_v7 = vpop.f32.mrb[20].mxu0  ;;  %v1055_v8 = vpop.f32.mrb[16].mxu1  ;;  %v2029_v9 = vsel %vm2028_vm5, %v7567_v4, -inf }
 0x312   : > { %v1950_v10 = vadd.f32 %v1894_v20, %v905_v7  ;;  %v1952_v11 = vadd.f32 %v1902_v22, %v1055_v8  ;;  %2030 = vmax.xlane.f32.xlu1 %v2029_v9  ;;  %v6707_v12 = vpop.f32.mrb[21].mxu0  ;;  %v6717_v13 = vpop.f32.mrb[17].mxu1  ;;  %v1997_v14 = vsel %vm1965_vm6, %v1949_v47, %v1981_v5  ;;  %v7589_v8 = vld [vmem:[%s7561_s24 + $0x18] sm:$0xff] }
 0x313   : > { %v7575_v15 = vmul.f32 %v1997_v14, %v7570_v6  ;;  %v1926_v2 = vpop.permute.xlu1 %1925 }
 0x314   : > { %vm1966_vm7 = vcmp.ge.f32.partialorder %v1950_v10, 0.0  ;;  %v1982_v19 = vmul.f32 0.2, %v1950_v10  ;;  %vm1968_vm8 = vcmp.ge.f32.partialorder %v1952_v11, 0.0  ;;  %v1984_v23 = vmul.f32 0.2, %v1952_v11 }
 0x315   : > { %v980_v24 = vpop.f32.mrb[22].mxu0  ;;  %v1205_v20 = vpop.f32.mrb[18].mxu1  ;;  %v2032_v22 = vsel %vm2028_vm5, %v7575_v15, -inf }
 0x316   : > { %v1951_v25 = vadd.f32 %v1898_v21, %v980_v24  ;;  %v1954_v26 = vadd.f32 %v1910_v30, %v1205_v20  ;;  %2033 = vmax.xlane.f32.xlu0 %v2032_v22  ;;  %v6712_v29 = vpop.f32.mrb[23].mxu0  ;;  %v6727_v47 = vpop.f32.mrb[19].mxu1  ;;  %v1998_v1 = vsel %vm1966_vm7, %v1950_v10, %v1982_v19  ;;  %v2000_v5 = vsel %vm1968_vm8, %v1952_v11, %v1984_v23  ;;  %v7597_v20 = vld [vmem:[%s7561_s24 + $0x30] sm:$0xff] }
 0x317   : > { %v7586_v7 = vmul.f32 %v1998_v1, %v7578_v16  ;;  %v7594_v10 = vmul.f32 %v2000_v5, %v7583_v3  ;;  %v7603_v47 = vld [vmem:[%s7561_s24 + $0x28] sm:$0xff]  ;;  %v1922_v1 = vpop.permute.xlu0 %1921  ;;  %v1934_v43 = vpop.permute.xlu1 %1933 }
 0x318   : > { %vm1967_vm9 = vcmp.ge.f32.partialorder %v1951_v25, 0.0  ;;  %v1983_v9 = vmul.f32 0.2, %v1951_v25  ;;  %vm1970_vm10 = vcmp.ge.f32.partialorder %v1954_v26, 0.0  ;;  %v1986_v12 = vmul.f32 0.2, %v1954_v26 }
 0x319   : > { %v1130_v21 = vpop.f32.mrb[24].mxu0  ;;  %v1355_v30 = vpop.f32.mrb[20].mxu1  ;;  %v2035_v13 = vsel %vm2028_vm5, %v7586_v7, -inf }
 0x31a   : > { %v1953_v11 = vadd.f32 %v1906_v28, %v1130_v21  ;;  %v1956_v14 = vadd.f32 %v1918_v18, %v1355_v30  ;;  %2036 = vmax.xlane.f32.xlu0 %v2035_v13  ;;  %v6722_v19 = vpop.f32.mrb[25].mxu0  ;;  %v6737_v23 = vpop.f32.mrb[21].mxu1  ;;  %v1999_v24 = vsel %vm1967_vm9, %v1951_v25, %v1983_v9  ;;  %v2002_v22 = vsel %vm1970_vm10, %v1954_v26, %v1986_v12 }
 0x31b   : > { %v7600_v29 = vmul.f32 %v1999_v24, %v7589_v8  ;;  %v2041_v26 = vsel %vm2028_vm5, %v7594_v10, -inf  ;;  %v7610_v9 = vmul.f32 %v2002_v22, %v7597_v20  ;;  %v7613_v24 = vld [vmem:[%s7561_s24 + $0x40] sm:$0xff]  ;;  %v1930_v42 = vpop.permute.xlu0 %1929  ;;  %v1942_v39 = vpop.permute.xlu1 %1941 }
 0x31c   : > { %vm1969_vm11 = vcmp.ge.f32.partialorder %v1953_v11, 0.0  ;;  %v1985_v5 = vmul.f32 0.2, %v1953_v11  ;;  %vm1972_vm12 = vcmp.ge.f32.partialorder %v1956_v14, 0.0  ;;  %v1988_v28 = vmul.f32 0.2, %v1956_v14 }
 0x31d   : > { %v1280_v18 = vpop.f32.mrb[26].mxu0  ;;  %v1505_v21 = vpop.f32.mrb[22].mxu1  ;;  %v2038_v25 = vsel %vm2028_vm5, %v7600_v29, -inf  ;;  %8641 = vst [vmem:[#allocation10_spill] sm:$0xff] %v7613_v24 }
 0x31e   : > { %v1955_v12 = vadd.f32 %v1914_v17, %v1280_v18  ;;  %v1958_v30 = vadd.f32 %v1926_v2, %v1505_v21  ;;  %2039 = vmax.xlane.f32.xlu1 %v2038_v25  ;;  %2042 = vmax.xlane.f32.xlu0 %v2041_v26  ;;  %v6732_v13 = vpop.f32.mrb[27].mxu0  ;;  %v6747_v19 = vpop.f32.mrb[23].mxu1  ;;  %v2001_v23 = vsel %vm1969_vm11, %v1953_v11, %v1985_v5  ;;  %v2047_v5 = vsel %vm2028_vm5, %v7610_v9, -inf }
 0x31f   : > { %v7616_v48 = vmul.f32 %v2001_v23, %v7603_v47  ;;  %v2004_v46 = vsel %vm1972_vm12, %v1956_v14, %v1988_v28  ;;  %v7630_v19 = vld [vmem:[%s7561_s24 + $0x50] sm:$0xff] }
 0x320   : > { %vm1971_vm13 = vcmp.ge.f32.partialorder %v1955_v12, 0.0  ;;  %v1987_v22 = vmul.f32 0.2, %v1955_v12  ;;  %vm1974_vm14 = vcmp.ge.f32.partialorder %v1958_v30, 0.0  ;;  %v1990_v2 = vmul.f32 0.2, %v1958_v30 }
 0x321   : > { %v1430_v17 = vpop.f32.mrb[28].mxu0  ;;  %v1655_v18 = vpop.f32.mrb[24].mxu1  ;;  %v2044_v11 = vsel %vm2028_vm5, %v7616_v48, -inf  ;;  %v7627_v21 = vmul.f32 %v2004_v46, %v7613_v24  ;;  %8643 = vst [vmem:[#allocation12_spill] sm:$0xff] %v7630_v19  ;;  %v7653_v24 = vld [vmem:[%s7561_s24 + $0x58] sm:$0xff] }
 0x322   : > { %v1957_v25 = vadd.f32 %v1922_v1, %v1430_v17  ;;  %v1960_v14 = vadd.f32 %v1934_v43, %v1655_v18  ;;  %2045 = vmax.xlane.f32.xlu1 %v2044_v11  ;;  %2048 = vmax.xlane.f32.xlu0 %v2047_v5  ;;  %v6742_v28 = vpop.f32.mrb[29].mxu0  ;;  %v6757_v26 = vpop.f32.mrb[25].mxu1  ;;  %v2003_v13 = vsel %vm1971_vm13, %v1955_v12, %v1987_v22 }
 0x323   : > { %v7633_v23 = vmul.f32 %v2003_v13, %v7619_v45  ;;  %v2006_v41 = vsel %vm1974_vm14, %v1958_v30, %v1990_v2  ;;  %v2053_v22 = vsel %vm2028_vm5, %v7627_v21, -inf  ;;  %v7647_v28 = vld [vmem:[%s7561_s24 + $0x60] sm:$0xff] }
 0x324   : > { %vm1973_vm15 = vcmp.ge.f32.partialorder %v1957_v25, 0.0  ;;  %v1989_v46 = vmul.f32 0.2, %v1957_v25  ;;  %vm1976_vm0 = vcmp.ge.f32.partialorder %v1960_v14, 0.0  ;;  %v1992_v43 = vmul.f32 0.2, %v1960_v14 }
 0x325   : > { %v1580_v1 = vpop.f32.mrb[30].mxu0  ;;  %v1805_v17 = vpop.f32.mrb[26].mxu1  ;;  %v2050_v12 = vsel %vm2028_vm5, %v7633_v23, -inf  ;;  %v7644_v18 = vmul.f32 %v2006_v41, %v7630_v19  ;;  %v7670_v19 = vld [vmem:[%s7561_s24 + $0x68] sm:$0xff] }
 0x326   : > { %v1959_v30 = vadd.f32 %v1930_v42, %v1580_v1  ;;  %v1962_v2 = vadd.f32 %v1942_v39, %v1805_v17  ;;  %2051 = vmax.xlane.f32.xlu1 %v2050_v12  ;;  %2054 = vmax.xlane.f32.xlu0 %v2053_v22  ;;  %v6752_v11 = vpop.f32.mrb[31].mxu0  ;;  %v2005_v5 = vsel %vm1973_vm15, %v1957_v25, %v1989_v46  ;;  %v6767_v26 = vpop.f32.mrb[27].mxu1  ;;  %v7664_v22 = vld [vmem:[%s7561_s24 + $0x70] sm:$0xff] }
 0x327   : > { %v7650_v13 = vmul.f32 %v2005_v5, %v7636_v44  ;;  %v2008_v45 = vsel %vm1976_vm0, %v1960_v14, %v1992_v43  ;;  %v1938_v39 = vpop.permute.xlu0 %1937  ;;  %v2059_v46 = vsel %vm2028_vm5, %v7644_v18, -inf  ;;  %8645 = vst [vmem:[#allocation14_spill] sm:$0xff] %v7670_v19 }
 0x328   : > { %vm1975_vm4 = vcmp.ge.f32.partialorder %v1959_v30, 0.0  ;;  %v1991_v41 = vmul.f32 0.2, %v1959_v30  ;;  %vm1978_vm6 = vcmp.ge.f32.partialorder %v1962_v2, 0.0  ;;  %v1994_v42 = vmul.f32 0.2, %v1962_v2 }
 0x329   : > { %v1730_v1 = vpop.f32.mrb[32].mxu0  ;;  %v2056_v25 = vsel %vm2028_vm5, %v7650_v13, -inf  ;;  %v7661_v17 = vmul.f32 %v2008_v45, %v7647_v28 }
 0x32a   : > { %v1961_v12 = vadd.f32 %v1938_v39, %v1730_v1  ;;  %2057 = vmax.xlane.f32.xlu1 %v2056_v25  ;;  %2060 = vmax.xlane.f32.xlu0 %v2059_v46  ;;  %v6762_v14 = vpop.f32.mrb[33].mxu0  ;;  %v2007_v43 = vsel %vm1975_vm4, %v1959_v30, %v1991_v41  ;;  %v2010_v11 = vsel %vm1978_vm6, %v1962_v2, %v1994_v42  ;;  %v7683_v46 = vld [vmem:[%s7561_s24 + $0x78] sm:$0xff] }
 0x32b   : > { %v7667_v5 = vmul.f32 %v2007_v43, %v7653_v24  ;;  %v1946_v44 = vpop.permute.xlu0 %1945  ;;  %v2065_v39 = vsel %vm2028_vm5, %v7661_v17, -inf  ;;  %v7677_v30 = vmul.f32 %v2010_v11, %v7664_v22  ;;  %8646 = vst [vmem:[#allocation15_spill] sm:$0xff] %v7683_v46  ;;  %v7211_v11 = vmov 1  }
 0x32c   : > { %vm1977_vm7 = vcmp.ge.f32.partialorder %v1961_v12, 0.0  ;;  %v1993_v26 = vmul.f32 0.2, %v1961_v12  ;;  %7053 = vset.pattern.permute.xlu0 %v7211_v11  ;;  %7052 = vset.pattern.permute.xlu1 %v7211_v11 }
 0x32d   : > { %v1880_v37 = vpop.f32.mrb[34].mxu0  ;;  %v2062_v45 = vsel %vm2028_vm5, %v7667_v5, -inf  ;;  %v2071_v43 = vsel %vm2028_vm5, %v7677_v30, -inf }
 0x32e   : > { %v1963_v2 = vadd.f32 %v1946_v44, %v1880_v37  ;;  %2063 = vmax.xlane.f32.xlu1 %v2062_v45  ;;  %2066 = vmax.xlane.f32.xlu0 %v2065_v39  ;;  %v2009_v41 = vsel %vm1977_vm7, %v1961_v12, %v1993_v26  ;;  %v6772_v42 = vpop.f32.mrb[35].mxu0 }
 0x32f   : > { %v7680_v1 = vmul.f32 %v2009_v41, %v7670_v19 }
 0x330   : > { %vm1979_vm8 = vcmp.ge.f32.partialorder %v1963_v2, 0.0  ;;  %v1995_v25 = vmul.f32 0.2, %v1963_v2 }
 0x331   : > { %v2068_v14 = vsel %vm2028_vm5, %v7680_v1, -inf }
 0x332   : > { %2069 = vmax.xlane.f32.xlu1 %v2068_v14  ;;  %2072 = vmax.xlane.f32.xlu0 %v2071_v43  ;;  %v2011_v37 = vsel %vm1979_vm8, %v1963_v2, %v1995_v25 }
 0x333   : > { %v7690_v44 = vmul.f32 %v2011_v37, %v7683_v46 }
 0x335   : > { %v2074_v12 = vsel %vm2028_vm5, %v7690_v44, -inf }
 0x336   : > { %2075 = vmax.xlane.f32.xlu1 %v2074_v12 }
 0x39f   : > { %v2031_v26 = vpop.xlane.xlu1 %2030 }
 0x3a0   : > { %v2077_v45 = vsub.f32 %v7567_v4, %v2031_v26 }
 0x3a2   : > { %v2093_v39 = vmul.f32 1.442695, %v2077_v45 }
 0x3a3   : > { %v2034_v41 = vpop.xlane.xlu0 %2033 }
 0x3a4   : > { %7054 = vpow2.f32 %v2093_v39  ;;  %v2078_v42 = vsub.f32 %v7575_v15, %v2034_v41 }
 0x3a6   : > { %v2095_v14 = vmul.f32 1.442695, %v2078_v42 }
 0x3a7   : > { %v2037_v2 = vpop.xlane.xlu0 %2036 }
 0x3a8   : > { %7056 = vpow2.f32 %v2095_v14  ;;  %v2079_v25 = vsub.f32 %v7586_v7, %v2037_v2 }
 0x3aa   : > { %v2097_v43 = vmul.f32 1.442695, %v2079_v25 }
 0x3ab   : > { %v2040_v37 = vpop.xlane.xlu1 %2039  ;;  %v2043_v46 = vpop.xlane.xlu0 %2042 }
 0x3ac   : > { %7058 = vpow2.f32 %v2097_v43  ;;  %v2080_v12 = vsub.f32 %v7600_v29, %v2040_v37  ;;  %v2081_v11 = vsub.f32 %v7594_v10, %v2043_v46 }
 0x3ae   : > { %v7699_v19 = vpop.eup %7054  ;;  %v2099_v4 = vmul.f32 1.442695, %v2080_v12  ;;  %v2101_v26 = vmul.f32 1.442695, %v2081_v11 }
 0x3af   : > { %v2046_v45 = vpop.xlane.xlu1 %2045  ;;  %v2049_v39 = vpop.xlane.xlu0 %2048  ;;  %v2125_v15 = vsel %vm2028_vm5, %v7699_v19, 0.0 }
 0x3b0   : > { %7060 = vpow2.f32 %v2099_v4  ;;  %v2082_v7 = vsub.f32 %v7616_v48, %v2046_v45  ;;  %v2083_v41 = vsub.f32 %v7610_v9, %v2049_v39  ;;  %2126 = vadd.xlane.f32.xlu0 %v2125_v15 }
 0x3b1   : > { %7062 = vpow2.f32 %v2101_v26 }
 0x3b2   : > { %v7705_v42 = vpop.eup %7056  ;;  %v2103_v29 = vmul.f32 1.442695, %v2082_v7  ;;  %v2105_v10 = vmul.f32 1.442695, %v2083_v41 }
 0x3b3   : > { %v2052_v46 = vpop.xlane.xlu1 %2051  ;;  %v2055_v14 = vpop.xlane.xlu0 %2054  ;;  %v2128_v2 = vsel %vm2028_vm5, %v7705_v42, 0.0 }
 0x3b4   : > { %7064 = vpow2.f32 %v2103_v29  ;;  %v2084_v25 = vsub.f32 %v7633_v23, %v2052_v46  ;;  %v2085_v43 = vsub.f32 %v7627_v21, %v2055_v14  ;;  %2129 = vadd.xlane.f32.xlu1 %v2128_v2 }
 0x3b5   : > { %7066 = vpow2.f32 %v2105_v10 }
 0x3b6   : > { %v7711_v48 = vpop.eup %7058  ;;  %v2107_v9 = vmul.f32 1.442695, %v2084_v25  ;;  %v2109_v37 = vmul.f32 1.442695, %v2085_v43 }
 0x3b7   : > { %v2058_v12 = vpop.xlane.xlu1 %2057  ;;  %v2061_v11 = vpop.xlane.xlu0 %2060  ;;  %v2131_v4 = vsel %vm2028_vm5, %v7711_v48, 0.0 }
 0x3b8   : > { %7068 = vpow2.f32 %v2107_v9  ;;  %v2086_v26 = vsub.f32 %v7650_v13, %v2058_v12  ;;  %v2087_v45 = vsub.f32 %v7644_v18, %v2061_v11  ;;  %2132 = vadd.xlane.f32.xlu0 %v2131_v4 }
 0x3b9   : > { %7070 = vpow2.f32 %v2109_v37 }
 0x3ba   : > { %v7717_v23 = vpop.eup %7060  ;;  %v2111_v21 = vmul.f32 1.442695, %v2086_v26  ;;  %v2113_v39 = vmul.f32 1.442695, %v2087_v45 }
 0x3bb   : > { %v7719_v15 = vpop.eup %7062  ;;  %v2064_v7 = vpop.xlane.xlu1 %2063  ;;  %v2134_v29 = vsel %vm2028_vm5, %v7717_v23, 0.0 }
 0x3bc   : > { %v2067_v41 = vpop.xlane.xlu0 %2066  ;;  %7072 = vpow2.f32 %v2111_v21  ;;  %v2088_v10 = vsub.f32 %v7667_v5, %v2064_v7  ;;  %2135 = vadd.xlane.f32.xlu1 %v2134_v29  ;;  %v2137_v18 = vsel %vm2028_vm5, %v7719_v15, 0.0 }
 0x3bd   : > { %v2089_v13 = vsub.f32 %v7661_v17, %v2067_v41  ;;  %7074 = vpow2.f32 %v2113_v39  ;;  %2138 = vadd.xlane.f32.xlu0 %v2137_v18 }
 0x3be   : > { %v7727_v46 = vpop.eup %7064  ;;  %v2115_v14 = vmul.f32 1.442695, %v2088_v10 }
 0x3bf   : > { %v2117_v2 = vmul.f32 1.442695, %v2089_v13  ;;  %v7729_v25 = vpop.eup %7066  ;;  %v2140_v9 = vsel %vm2028_vm5, %v7727_v46, 0.0 }
 0x3c0   : > { %v2073_v43 = vpop.xlane.xlu0 %2072  ;;  %7076 = vpow2.f32 %v2115_v14  ;;  %2141 = vadd.xlane.f32.xlu1 %v2140_v9  ;;  %v2143_v17 = vsel %vm2028_vm5, %v7729_v25, 0.0  ;;  %v2070_v14 = vpop.xlane.xlu1 %2069 }
 0x3c1   : > { %v2091_v5 = vsub.f32 %v7677_v30, %v2073_v43  ;;  %7078 = vpow2.f32 %v2117_v2  ;;  %2144 = vadd.xlane.f32.xlu0 %v2143_v17  ;;  %v2090_v2 = vsub.f32 %v7680_v1, %v2070_v14 }
 0x3c2   : > { %v7736_v37 = vpop.eup %7068 }
 0x3c3   : > { %v2121_v12 = vmul.f32 1.442695, %v2091_v5  ;;  %v7738_v11 = vpop.eup %7070  ;;  %v2146_v4 = vsel %vm2028_vm5, %v7736_v37, 0.0  ;;  %v2119_v9 = vmul.f32 1.442695, %v2090_v2 }
 0x3c4   : > { %2147 = vadd.xlane.f32.xlu1 %v2146_v4  ;;  %v2149_v26 = vsel %vm2028_vm5, %v7738_v11, 0.0  ;;  %v2076_v43 = vpop.xlane.xlu1 %2075 }
 0x3c5   : > { %7080 = vpow2.f32 %v2121_v12  ;;  %2150 = vadd.xlane.f32.xlu0 %v2149_v26  ;;  %v2092_v5 = vsub.f32 %v7690_v44, %v2076_v43 }
 0x3c6   : > { %v7744_v30 = vpop.eup %7072  ;;  %7082 = vpow2.f32 %v2119_v9 }
 0x3c7   : > { %v7746_v45 = vpop.eup %7074  ;;  %v2152_v21 = vsel %vm2028_vm5, %v7744_v30, 0.0  ;;  %v2123_v17 = vmul.f32 1.442695, %v2092_v5 }
 0x3c8   : > { %2153 = vadd.xlane.f32.xlu1 %v2152_v21  ;;  %v2155_v39 = vsel %vm2028_vm5, %v7746_v45, 0.0 }
 0x3c9   : > { %2156 = vadd.xlane.f32.xlu0 %v2155_v39  ;;  %7084 = vpow2.f32 %v2123_v17  ;;  %v8652_v17 = vld [vmem:[#allocation13_spill] sm:$0xff] }
 0x3ca   : > { %v7752_v7 = vpop.eup %7076 }
 0x3cb   : > { %v7754_v41 = vpop.eup %7078  ;;  %v2158_v29 = vsel %vm2028_vm5, %v7752_v7, 0.0 }
 0x3cc   : > { %2159 = vadd.xlane.f32.xlu1 %v2158_v29  ;;  %v2161_v10 = vsel %vm2028_vm5, %v7754_v41, 0.0 }
 0x3cd   : > { %2162 = vadd.xlane.f32.xlu0 %v2161_v10 }
 0x3cf   : > { %v7760_v13 = vpop.eup %7080 }
 0x3d0   : > { %v2167_v18 = vsel %vm2028_vm5, %v7760_v13, 0.0  ;;  %v7780_v1 = vpop.eup %7082 }
 0x3d1   : > { %2168 = vadd.xlane.f32.xlu0 %v2167_v18  ;;  %v2164_v44 = vsel %vm2028_vm5, %v7780_v1, 0.0 }
 0x3d3   : > { %v7786_v12 = vpop.eup %7084 }
 0x3d4   : > { %v2170_v4 = vsel %vm2028_vm5, %v7786_v12, 0.0 }
 0x3dd   : > { %3463 = vrot.lane.b32.xlu1 %v7393_v49, %s7212_s25 }
 0x3e7   : > { %3389 = vrot.lane.b32.xlu0 %v7395_v50, %s7212_s25 }
 0x3eb   : > { %3611 = vrot.lane.b32.xlu0 %v7398_v51, %s7212_s25 }
 0x3ef   : > { %3759 = vrot.lane.b32.xlu0 %v7404_v53, %s7212_s25 }
 0x3f3   : > { %3907 = vrot.lane.b32.xlu0 %v7410_v55, %s7212_s25 }
 0x3f7   : > { %4055 = vrot.lane.b32.xlu0 %v7416_v57, %s7212_s25 }
 0x3fb   : > { %4203 = vrot.lane.b32.xlu0 %v7422_v59, %s7212_s25 }
 0x3ff   : > { %4351 = vrot.lane.b32.xlu0 %v7428_v61, %s7212_s25 }
 0x401   : > { %2165 = vadd.xlane.f32.xlu1 %v2164_v44 }
 0x403   : > { %4499 = vrot.lane.b32.xlu0 %v7434_v63, %s7212_s25 }
 0x405   : > { %2171 = vadd.xlane.f32.xlu1 %v2170_v4 }
 0x407   : > { %4578 = vperm.xlu0 %7053, %v7393_v49  }
 0x40b   : > { %4590 = vperm.xlu0 %7053, %v7406_v54  }
 0x40f   : > { %4598 = vperm.xlu0 %7053, %v7412_v56  }
 0x413   : > { %4606 = vperm.xlu0 %7053, %v7418_v58  }
 0x416   : > { %3537 = vrot.lane.b32.xlu1 %v7400_v52, %s7212_s25 }
 0x417   : > { %4614 = vperm.xlu0 %7053, %v7424_v60  }
 0x41a   : > { %3685 = vrot.lane.b32.xlu1 %v7406_v54, %s7212_s25 }
 0x41b   : > { %4622 = vperm.xlu0 %7053, %v7430_v62  }
 0x41e   : > { %3833 = vrot.lane.b32.xlu1 %v7412_v56, %s7212_s25 }
 0x41f   : > { %4630 = vperm.xlu0 %7053, %v7436_v0  }
 0x422   : > { %3981 = vrot.lane.b32.xlu1 %v7418_v58, %s7212_s25 }
 0x423   : > { %4985 = vrot.lane.b32.xlu0 %v7323_v31, %s7213_s26 }
 0x426   : > { %4129 = vrot.lane.b32.xlu1 %v7424_v60, %s7212_s25 }
 0x427   : > { %5213 = vrot.lane.b32.xlu0 %v7341_v36, %s7213_s26 }
 0x42a   : > { %4277 = vrot.lane.b32.xlu1 %v7430_v62, %s7212_s25 }
 0x42b   : > { %5365 = vrot.lane.b32.xlu0 %v7349_v38, %s7213_s26 }
 0x42e   : > { %4425 = vrot.lane.b32.xlu1 %v7436_v0, %s7212_s25  ;;  %v8647_v0 = vmov 0.0  }
 0x42f   : > { %5517 = vrot.lane.b32.xlu0 %v7357_v40, %s7213_s26 }
 0x432   : > { %4574 = vperm.xlu1 %7052, %v7395_v50  }
 0x436   : > { %4582 = vperm.xlu1 %7052, %v7400_v52  }
 0x43a   : > { %4586 = vperm.xlu1 %7052, %v7398_v51  }
 0x43d   : > { %v2127_v31 = vpop.xlane.xlu0 %2126 }
 0x43e   : > { %7086 = vrcp.f32 %v2127_v31  ;;  %4594 = vperm.xlu1 %7052, %v7404_v53   ;;  %v8653_v31 = vld [vmem:[#allocation5_spill] sm:$0xff] }
 0x441   : > { %v2130_v49 = vpop.xlane.xlu1 %2129 }
 0x442   : > { %7088 = vrcp.f32 %v2130_v49  ;;  %4602 = vperm.xlu1 %7052, %v7410_v55  }
 0x445   : > { %v2133_v54 = vpop.xlane.xlu0 %2132 }
 0x446   : > { %7090 = vrcp.f32 %v2133_v54  ;;  %4610 = vperm.xlu1 %7052, %v7416_v57  }
 0x448   : > { %v7087_v56 = vpop.eup %7086 }
 0x449   : > { %v2174_v58 = vmul.f32 %v7087_v56, %v7699_v19  ;;  %v2136_v50 = vpop.xlane.xlu1 %2135 }
 0x44a   : > { %7092 = vrcp.f32 %v2136_v50  ;;  %v2139_v52 = vpop.xlane.xlu0 %2138  ;;  %4618 = vperm.xlu1 %7052, %v7422_v59  }
 0x44b   : > { %7094 = vrcp.f32 %v2139_v52  ;;  %v2205_v51 = vmul.f32 %v2174_v58, %v7564_v27  ;;  %v8655_v58 = vld [vmem:[#allocation4_spill] sm:$0xff] }
 0x44c   : > { %v7089_v53 = vpop.eup %7088 }
 0x44d   : > { %v2176_v60 = vmul.f32 %v7089_v53, %v7705_v42  ;;  %v2142_v62 = vpop.xlane.xlu1 %2141  ;;  %6776 = vmatmul.mubr.msk.f32.vlgmr.msra.gmra.mrb[28].mxu1 %vm2028_vm5, %v2205_v51  ;;  %v8658_v53 = vld [vmem:[#allocation9_spill] sm:$0xff] }
 0x44e   : > { %7096 = vrcp.f32 %v2142_v62  ;;  %6784 = vmatpush3.msra.mxu1 %v7333_v34  ;;  %v2145_v55 = vpop.xlane.xlu0 %2144  ;;  %4626 = vperm.xlu1 %7052, %v7428_v61  }
 0x44f   : > { %7098 = vrcp.f32 %v2145_v55  ;;  %v2206_v57 = vmul.f32 %v2176_v60, %v7570_v6  ;;  %6785 = vmatprep.mubr.msk.f32.mxu1 %vm7208_vm2, %v8647_v0  ;;  %6793 = vmatprep.subr.mxu1 %v8647_v0 }
 0x450   : > { %v7091_v59 = vpop.eup %7090 }
 0x451   : > { %v2178_v27 = vmul.f32 %v7091_v59, %v7711_v48  ;;  %6781 = vmatmul.mubr.msk.f32.vlgmr.msra.gmra.mrb[36].mxu0 %vm2028_vm5, %v2206_v57  ;;  %v2148_v19 = vpop.xlane.xlu1 %2147 }
 0x452   : > { %6789 = vmatpush3.msra.mxu0 %v7331_v33  ;;  %7100 = vrcp.f32 %v2148_v19  ;;  %v2151_v42 = vpop.xlane.xlu0 %2150  ;;  %4634 = vperm.xlu1 %7052, %v7434_v63  }
 0x453   : > { %7102 = vrcp.f32 %v2151_v42  ;;  %v2207_v61 = vmul.f32 %v2178_v27, %v7578_v16  ;;  %6790 = vmatprep.mubr.msk.f32.mxu0 %vm7208_vm2, %v8647_v0  ;;  %6798 = vmatprep.subr.mxu0 %v8647_v0 }
 0x454   : > { %v7093_v6 = vpop.eup %7092 }
 0x455   : > { %v7095_v26 = vpop.eup %7094  ;;  %v2180_v48 = vmul.f32 %v7093_v6, %v7717_v23  ;;  %v2154_v21 = vpop.xlane.xlu1 %2153  ;;  %6786 = vmatmul.mubr.msk.f32.vlgmr.msra.gmra.mrb[30].mxu1 %vm2028_vm5, %v2207_v61 }
 0x456   : > { %v2182_v39 = vmul.f32 %v7095_v26, %v7719_v15  ;;  %7104 = vrcp.f32 %v2154_v21  ;;  %6794 = vmatpush3.msra.mxu1 %v7341_v36  ;;  %v2157_v63 = vpop.xlane.xlu0 %2156  ;;  %4909 = vrot.lane.b32.xlu1 %v7325_v32, %s7213_s26 }
 0x457   : > { %7106 = vrcp.f32 %v2157_v63  ;;  %6795 = vmatprep.mubr.msk.f32.mxu1 %vm7208_vm2, %v8647_v0  ;;  %6803 = vmatprep.subr.mxu1 %v8647_v0  ;;  %v2208_v16 = vmul.f32 %v2180_v48, %v7589_v8  ;;  %v8660_v63 = vld [vmem:[#allocation14_spill] sm:$0xff] }
 0x458   : > { %v7097_v23 = vpop.eup %7096  ;;  %v2209_v29 = vmul.f32 %v2182_v39, %v7583_v3 }
 0x459   : > { %v7099_v10 = vpop.eup %7098  ;;  %v2184_v15 = vmul.f32 %v7097_v23, %v7727_v46  ;;  %6791 = vmatmul.mubr.msk.f32.vlgmr.msra.gmra.mrb[38].mxu0 %vm2028_vm5, %v2208_v16  ;;  %v2160_v36 = vpop.xlane.xlu1 %2159 }
 0x45a   : > { %v2186_v18 = vmul.f32 %v7099_v10, %v7729_v25  ;;  %6799 = vmatpush3.msra.mxu0 %v7339_v35  ;;  %7108 = vrcp.f32 %v2160_v36  ;;  %6796 = vmatmul.mubr.msk.f32.vlgmr.msra.gmra.mrb[32].mxu1 %vm2028_vm5, %v2209_v29  ;;  %v2163_v32 = vpop.xlane.xlu0 %2162  ;;  %v8661_v10 = vld [vmem:[#allocation8_spill] sm:$0xff] }
 0x45b   : > { %6804 = vmatpush3.msra.mxu1 %v7349_v38  ;;  %7110 = vrcp.f32 %v2163_v32  ;;  %5061 = vrot.lane.b32.xlu1 %v7333_v34, %s7213_s26  ;;  %v2210_v3 = vmul.f32 %v2184_v15, %v7603_v47  ;;  %v8648_v47 = vld [vmem:[#allocation2_spill] sm:$0xff]  ;;  %v8662_v15 = vld [vmem:[#allocation15_spill] sm:$0xff] }
 0x45c   : > { %v7101_v8 = vpop.eup %7100  ;;  %6800 = vmatprep.mubr.msk.f32.mxu0 %vm7208_vm2, %v8647_v0  ;;  %6805 = vmatprep.mubr.msk.f32.mxu1 %vm7208_vm2, %v8647_v0  ;;  %v2211_v46 = vmul.f32 %v2186_v18, %v7597_v20  ;;  %v8649_v20 = vld [vmem:[#allocation11_spill] sm:$0xff] }
 0x45d   : > { %v7103_v25 = vpop.eup %7102  ;;  %v2188_v14 = vmul.f32 %v7101_v8, %v7736_v37  ;;  %6808 = vmatprep.subr.mxu0 %v8647_v0  ;;  %6813 = vmatprep.subr.mxu1 %v8647_v0  ;;  %v8650_v37 = vld [vmem:[#allocation10_spill] sm:$0xff]  ;;  %v3464_v57 = vpop.permute.xlu1 %3463 }
 0x45e   : > { %v2190_v34 = vmul.f32 %v7103_v25, %v7738_v11  ;;  %6801 = vmatmul.mubr.msk.f32.vlgmr.msra.gmra.mrb[40].mxu0 %vm2028_vm5, %v2210_v3  ;;  %6806 = vmatmul.mubr.msk.f32.vlgmr.msra.gmra.mrb[34].mxu1 %vm2028_vm5, %v2211_v46  ;;  %v2169_v38 = vpop.xlane.xlu0 %2168 }
 0x45f   : > { %6809 = vmatpush3.msra.mxu0 %v8648_v47  ;;  %6814 = vmatpush3.msra.mxu1 %v7357_v40  ;;  %7112 = vrcp.f32 %v2169_v38  ;;  %v2212_v2 = vmul.f32 %v2188_v14, %v8649_v20 }
 0x460   : > { %v7105_v43 = vpop.eup %7104  ;;  %5137 = vrot.lane.b32.xlu1 %v7331_v33, %s7213_s26  ;;  %6810 = vmatprep.mubr.msk.f32.mxu0 %vm7208_vm2, %v8647_v0  ;;  %v2213_v11 = vmul.f32 %v2190_v34, %v8650_v37  ;;  %v8651_v33 = vld [vmem:[#allocation3_spill] sm:$0xff] }
 0x461   : > { %v7107_v9 = vpop.eup %7106  ;;  %v2192_v5 = vmul.f32 %v7105_v43, %v7744_v30  ;;  %6815 = vmatprep.mubr.msk.f32.mxu1 %vm7208_vm2, %v8647_v0  ;;  %6818 = vmatprep.subr.mxu0 %v8647_v0  ;;  %v8654_v30 = vld [vmem:[#allocation12_spill] sm:$0xff] }
 0x462   : > { %v2194_v40 = vmul.f32 %v7107_v9, %v7746_v45  ;;  %6823 = vmatprep.subr.mxu1 %v8647_v0  ;;  %6811 = vmatmul.mubr.msk.f32.vlgmr.msra.gmra.mrb[42].mxu0 %vm2028_vm5, %v2212_v2  ;;  %v3390_v51 = vpop.permute.xlu0 %3389 }
 0x463   : > { %6816 = vmatmul.mubr.msk.f32.vlgmr.msra.gmra.mrb[36].mxu1 %vm2028_vm5, %v2213_v11  ;;  %6819 = vmatpush3.msra.mxu0 %v8651_v33  ;;  %v2214_v44 = vmul.f32 %v2192_v5, %v8652_v17 }
 0x464   : > { %v7109_v4 = vpop.eup %7108  ;;  %6824 = vmatpush3.msra.mxu1 %v8653_v31  ;;  %5289 = vrot.lane.b32.xlu1 %v7339_v35, %s7213_s26  ;;  %v2215_v49 = vmul.f32 %v2194_v40, %v8654_v30 }
 0x465   : > { %v7111_v54 = vpop.eup %7110  ;;  %v2196_v45 = vmul.f32 %v7109_v4, %v7752_v7  ;;  %6820 = vmatprep.mubr.msk.f32.mxu0 %vm7208_vm2, %v8647_v0  ;;  %6825 = vmatprep.mubr.msk.f32.mxu1 %vm7208_vm2, %v8647_v0  ;;  %v8656_v7 = vld [vmem:[#allocation7_spill] sm:$0xff] }
 0x466   : > { %v2198_v56 = vmul.f32 %v7111_v54, %v7754_v41  ;;  %6828 = vmatprep.subr.mxu0 %v8647_v0  ;;  %6833 = vmatprep.subr.mxu1 %v8647_v0 }
 0x467   : > { %6821 = vmatmul.mubr.msk.f32.vlgmr.msra.gmra.mrb[44].mxu0 %vm2028_vm5, %v2214_v44  ;;  %6826 = vmatmul.mubr.msk.f32.vlgmr.msra.gmra.mrb[38].mxu1 %vm2028_vm5, %v2215_v49  ;;  %v2216_v35 = vmul.f32 %v2196_v45, %v7653_v24  ;;  %v8657_v24 = vld [vmem:[#allocation6_spill] sm:$0xff] }
 0x468   : > { %6829 = vmatpush3.msra.mxu0 %v8655_v58  ;;  %6834 = vmatpush3.msra.mxu1 %v8656_v7  ;;  %v2217_v50 = vmul.f32 %v2198_v56, %v7647_v28 }
 0x469   : > { %v7113_v52 = vpop.eup %7112  ;;  %5441 = vrot.lane.b32.xlu1 %v8648_v47, %s7213_s26  ;;  %6830 = vmatprep.mubr.msk.f32.mxu0 %vm7208_vm2, %v8647_v0 }
 0x46a   : > { %v2202_v41 = vmul.f32 %v7113_v52, %v7760_v13  ;;  %6835 = vmatprep.mubr.msk.f32.mxu1 %vm7208_vm2, %v8647_v0  ;;  %6838 = vmatprep.subr.mxu0 %v8647_v0  ;;  %v8659_v13 = vmov 1.0  }
 0x46b   : > { %6843 = vmatprep.subr.mxu1 %v8647_v0  ;;  %6831 = vmatmul.mubr.msk.f32.vlgmr.msra.gmra.mrb[46].mxu0 %vm2028_vm5, %v2216_v35 }
 0x46c   : > { %6836 = vmatmul.mubr.msk.f32.vlgmr.msra.gmra.mrb[40].mxu1 %vm2028_vm5, %v2217_v50  ;;  %6839 = vmatpush3.msra.mxu0 %v8657_v24  ;;  %v2219_v28 = vmul.f32 %v2202_v41, %v7664_v22  ;;  %v3612_v22 = vpop.permute.xlu0 %3611 }
 0x46d   : > { %6844 = vmatpush3.msra.mxu1 %v8658_v53  ;;  %5593 = vrot.lane.b32.xlu1 %v8651_v33, %s7213_s26 }
 0x46e   : > { %6845 = vmatprep.mubr.msk.f32.mxu1 %vm7208_vm2, %v8647_v0  ;;  %6853 = vmatprep.subr.mxu1 %v8647_v0 }
 0x46f   : > { %6840 = vmatprep.mubr.msk.f32.mxu0 %vm7208_vm2, %v8647_v0  ;;  %6848 = vmatprep.subr.mxu0 %v8647_v0 }
 0x470   : > { %6846 = vmatmul.mubr.msk.f32.vlgmr.msra.gmra.mrb[42].mxu1 %vm2028_vm5, %v2219_v28  ;;  %v3760_v60 = vpop.permute.xlu0 %3759 }
 0x471   : > { %6855 = vmatprep.mubr.msk.f32.mxu1 %vm7208_vm2, %v8647_v0 }
 0x474   : > { %6854 = vmatpush3.xpose.msk.msra.mxu1 %vm683_vm3, %v3390_v51  ;;  %v7944_v62 = vpop.permute.xlu0 %3907 }
 0x475   : > { %6863 = vmatprep.subr.mxu1 %v8647_v0 }
 0x477   : > { %6856 = vmatmul.mubr.msk.f32.vlgmr.msra.gmra.mrb[44].mxu1 %vm683_vm3, %v8659_v13 }
 0x478   : > { %6865 = vmatprep.mubr.msk.f32.mxu1 %vm7208_vm2, %v8647_v0  ;;  %v7946_v55 = vpop.permute.xlu0 %4055 }
 0x47c   : > { %v7948_v59 = vpop.permute.xlu0 %4203 }
 0x480   : > { %v7950_v19 = vpop.permute.xlu0 %4351 }
 0x484   : > { %v7952_v6 = vpop.permute.xlu0 %4499 }
 0x488   : > { %v7959_v39 = vpop.permute.xlu0 %4578 }
 0x48c   : > { %v7977_v18 = vpop.permute.xlu0 %4590 }
 0x48e   : > { %v2166_v27 = vpop.xlane.xlu1 %2165 }
 0x48f   : > { %7114 = vrcp.f32 %v2166_v27 }
 0x490   : > { %v7993_v3 = vpop.permute.xlu0 %4598 }
 0x492   : > { %v2172_v42 = vpop.xlane.xlu1 %2171 }
 0x493   : > { %7116 = vrcp.f32 %v2172_v42 }
 0x494   : > { %v8011_v46 = vpop.permute.xlu0 %4606 }
 0x496   : > { %v3538_v61 = vpop.permute.xlu1 %3537 }
 0x497   : > { %6864 = vmatpush3.xpose.msk.msra.mxu1 %vm683_vm3, %v3538_v61 }
 0x498   : > { %6873 = vmatprep.subr.mxu1 %v8647_v0  ;;  %v8034_v34 = vpop.permute.xlu0 %4614 }
 0x499   : > { %v7115_v26 = vpop.eup %7114 }
 0x49a   : > { %v2200_v48 = vmul.f32 %v7115_v26, %v7780_v1  ;;  %v3686_v21 = vpop.permute.xlu1 %3685  ;;  %6866 = vmatmul.mubr.msk.f32.vlgmr.msra.gmra.mrb[46].mxu1 %vm683_vm3, %v8659_v13 }
 0x49b   : > { %6874 = vmatpush3.xpose.msk.msra.mxu1 %vm683_vm3, %v3686_v21  ;;  %6875 = vmatprep.mubr.msk.f32.mxu1 %vm7208_vm2, %v8647_v0 }
 0x49c   : > { %v2218_v16 = vmul.f32 %v2200_v48, %v8660_v63  ;;  %6883 = vmatprep.subr.mxu1 %v8647_v0  ;;  %v8050_v47 = vpop.permute.xlu0 %4622 }
 0x49d   : > { %v7117_v23 = vpop.eup %7116 }
 0x49e   : > { %v2204_v29 = vmul.f32 %v7117_v23, %v7786_v12  ;;  %6841 = vmatmul.mubr.msk.f32.vlgmr.msra.gmra.mrb[48].mxu0 %vm2028_vm5, %v2218_v16  ;;  %v3834_v1 = vpop.permute.xlu1 %3833  ;;  %6876 = vmatmul.mubr.msk.f32.vlgmr.msra.gmra.mrb[48].mxu1 %vm683_vm3, %v8659_v13 }
 0x49f   : > { %6849 = vmatpush3.msra.mxu0 %v8661_v10  ;;  %6884 = vmatpush3.xpose.msk.msra.mxu1 %vm683_vm3, %v3834_v1 }
 0x4a0   : > { %6850 = vmatprep.mubr.msk.f32.mxu0 %vm7208_vm2, %v8647_v0  ;;  %6885 = vmatprep.mubr.msk.f32.mxu1 %vm7208_vm2, %v8647_v0  ;;  %v2220_v36 = vmul.f32 %v2204_v29, %v8662_v15  ;;  %v8069_v43 = vpop.permute.xlu0 %4630  ;;  %v8125_v15 = vld [vmem:[%s7561_s24] sm:$0xff] }
 0x4a1   : > { %6893 = vmatprep.subr.mxu1 %v8647_v0  ;;  %6858 = vmatprep.subr.mxu0 %v8647_v0 }
 0x4a2   : > { %6851 = vmatmul.mubr.msk.f32.vlgmr.msra.gmra.mrb[50].mxu0 %vm2028_vm5, %v2220_v36  ;;  %v3982_v12 = vpop.permute.xlu1 %3981  ;;  %6886 = vmatmul.mubr.msk.f32.vlgmr.msra.gmra.mrb[50].mxu1 %vm683_vm3, %v8659_v13 }
 0x4a3   : > { %6894 = vmatpush3.xpose.msk.msra.mxu1 %vm683_vm3, %v3982_v12  ;;  %6895 = vmatprep.mubr.msk.f32.mxu1 %vm7208_vm2, %v8647_v0 }
 0x4a4   : > { %6903 = vmatprep.subr.mxu1 %v8647_v0  ;;  %6860 = vmatprep.mubr.msk.f32.mxu0 %vm7208_vm2, %v8647_v0  ;;  %v4986_v11 = vpop.permute.xlu0 %4985 }
 0x4a6   : > { %6859 = vmatpush3.xpose.msk.msra.mxu0 %vm683_vm3, %v3464_v57  ;;  %v4130_v32 = vpop.permute.xlu1 %4129  ;;  %6896 = vmatmul.mubr.msk.f32.vlgmr.msra.gmra.mrb[52].mxu1 %vm683_vm3, %v8659_v13 }
 0x4a7   : > { %6904 = vmatpush3.xpose.msk.msra.mxu1 %vm683_vm3, %v4130_v32  ;;  %6868 = vmatprep.subr.mxu0 %v8647_v0 }
 0x4a8   : > { %6905 = vmatprep.mubr.msk.f32.mxu1 %vm7208_vm2, %v8647_v0  ;;  %6913 = vmatprep.subr.mxu1 %v8647_v0 }
 0x4a9   : > { %6861 = vmatmul.mubr.msk.f32.vlgmr.msra.gmra.mrb[52].mxu0 %vm683_vm3, %v8659_v13 }
 0x4aa   : > { %6869 = vmatpush3.xpose.msk.msra.mxu0 %vm683_vm3, %v3612_v22  ;;  %v4278_v8 = vpop.permute.xlu1 %4277  ;;  %6906 = vmatmul.mubr.msk.f32.vlgmr.msra.gmra.mrb[54].mxu1 %vm683_vm3, %v8659_v13 }
 0x4ab   : > { %6870 = vmatprep.mubr.msk.f32.mxu0 %vm7208_vm2, %v8647_v0  ;;  %6914 = vmatpush3.xpose.msk.msra.mxu1 %vm683_vm3, %v4278_v8 }
 0x4ac   : > { %6878 = vmatprep.subr.mxu0 %v8647_v0  ;;  %6915 = vmatprep.mubr.msk.f32.mxu1 %vm7208_vm2, %v8647_v0 }
 0x4ad   : > { %6871 = vmatmul.mubr.msk.f32.vlgmr.msra.gmra.mrb[54].mxu0 %vm683_vm3, %v8659_v13  ;;  %6923 = vmatprep.subr.mxu1 %v8647_v0 }
 0x4ae   : > { %6879 = vmatpush3.xpose.msk.msra.mxu0 %vm683_vm3, %v3760_v60  ;;  %v4426_v25 = vpop.permute.xlu1 %4425  ;;  %6916 = vmatmul.mubr.msk.f32.vlgmr.msra.gmra.mrb[56].mxu1 %vm683_vm3, %v8659_v13 }
 0x4af   : > { %6880 = vmatprep.mubr.msk.f32.mxu0 %vm7208_vm2, %v8647_v0  ;;  %6924 = vmatpush3.xpose.msk.msra.mxu1 %vm683_vm3, %v4426_v25 }
 0x4b0   : > { %6888 = vmatprep.subr.mxu0 %v8647_v0  ;;  %6925 = vmatprep.mubr.msk.f32.mxu1 %vm7208_vm2, %v8647_v0 }
 0x4b1   : > { %6881 = vmatmul.mubr.msk.f32.vlgmr.msra.gmra.mrb[56].mxu0 %vm683_vm3, %v8659_v13  ;;  %6933 = vmatprep.subr.mxu1 %v8647_v0 }
 0x4b2   : > { %6889 = vmatpush3.xpose.msk.msra.mxu0 %vm683_vm3, %v7944_v62  ;;  %v8030_v14 = vpop.permute.xlu1 %4574  ;;  %6926 = vmatmul.mubr.msk.f32.vlgmr.msra.gmra.mrb[58].mxu1 %vm683_vm3, %v8659_v13 }
 0x4b3   : > { %6890 = vmatprep.mubr.msk.f32.mxu0 %vm7208_vm2, %v8647_v0  ;;  %6898 = vmatprep.subr.mxu0 %v8647_v0 }
 0x4b4   : > { %6935 = vmatprep.mubr.msk.f32.mxu1 %vm7208_vm2, %v8647_v0 }
 0x4b5   : > { %6891 = vmatmul.mubr.msk.f32.vlgmr.msra.gmra.mrb[58].mxu0 %vm683_vm3, %v8659_v13 }
 0x4b6   : > { %6899 = vmatpush3.xpose.msk.msra.mxu0 %vm683_vm3, %v7946_v55  ;;  %v8045_v38 = vpop.permute.xlu1 %4582  ;;  %6900 = vmatprep.mubr.msk.f32.mxu0 %vm7208_vm2, %v8647_v0 }
 0x4b7   : > { %6908 = vmatprep.subr.mxu0 %v8647_v0 }
 0x4b9   : > { %6901 = vmatmul.mubr.msk.f32.vlgmr.msra.gmra.mrb[60].mxu0 %vm683_vm3, %v8659_v13 }
 0x4ba   : > { %6909 = vmatpush3.xpose.msk.msra.mxu0 %vm683_vm3, %v7948_v59  ;;  %v8056_v20 = vpop.permute.xlu1 %4586  ;;  %6910 = vmatprep.mubr.msk.f32.mxu0 %vm7208_vm2, %v8647_v0 }
 0x4bb   : > { %6918 = vmatprep.subr.mxu0 %v8647_v0 }
 0x4bd   : > { %6911 = vmatmul.mubr.msk.f32.vlgmr.msra.gmra.mrb[62].mxu0 %vm683_vm3, %v8659_v13 }
 0x4be   : > { %6919 = vmatpush3.xpose.msk.msra.mxu0 %vm683_vm3, %v7950_v19  ;;  %v8065_v2 = vpop.permute.xlu1 %4594  ;;  %6920 = vmatprep.mubr.msk.f32.mxu0 %vm7208_vm2, %v8647_v0 }
 0x4bf   : > { %6928 = vmatprep.subr.mxu0 %v8647_v0 }
 0x4c1   : > { %6921 = vmatmul.mubr.msk.f32.vlgmr.msra.gmra.mrb[64].mxu0 %vm683_vm3, %v8659_v13 }
 0x4c2   : > { %6929 = vmatpush3.xpose.msk.msra.mxu0 %vm683_vm3, %v7952_v6  ;;  %v8076_v37 = vpop.permute.xlu1 %4602  ;;  %6930 = vmatprep.mubr.msk.f32.mxu0 %vm7208_vm2, %v8647_v0 }
 0x4c3   : > { %6938 = vmatprep.subr.mxu0 %v8647_v0 }
 0x4c5   : > { %6931 = vmatmul.mubr.msk.f32.vlgmr.msra.gmra.mrb[66].mxu0 %vm683_vm3, %v8659_v13 }
 0x4c6   : > { %6939 = vmatpush3.msra.mxu0 %v4986_v11  ;;  %v8083_v9 = vpop.permute.xlu1 %4610  ;;  %6940 = vmatprep.mubr.msk.f32.mxu0 %vm7208_vm2, %v8647_v0 }
 0x4c7   : > { %6948 = vmatprep.subr.mxu0 %v8647_v0 }
 0x4ca   : > { %v8088_v5 = vpop.permute.xlu1 %4618 }
 0x4ce   : > { %v8090_v40 = vpop.permute.xlu1 %4626 }
 0x4d2   : > { %v8092_v33 = vpop.permute.xlu1 %4634 }
 0x4d6   : > { %v4910_v17 = vpop.permute.xlu1 %4909 }
 0x4d7   : > { %6934 = vmatpush3.msra.mxu1 %v4910_v17 }
 0x4d8   : > { %6943 = vmatprep.subr.mxu1 %v8647_v0 }
 0x520   : > { %v8095_v44 = vpop.f32.mrb[28].mxu1 }
 0x521   : > { %v6777_v4 = vpop.f32.mrb[29].mxu1 }
 0x524   : > { %v8097_v30 = vpop.f32.mrb[36].mxu0 }
 0x525   : > { %v6782_v49 = vpop.f32.mrb[37].mxu0 }
 0x528   : > { %v8099_v54 = vpop.f32.mrb[30].mxu1 }
 0x529   : > { %v6787_v45 = vpop.f32.mrb[31].mxu1 }
 0x52c   : > { %v8101_v56 = vpop.f32.mrb[38].mxu0 }
 0x52d   : > { %v8103_v35 = vpop.f32.mrb[32].mxu1  ;;  %v6792_v50 = vpop.f32.mrb[39].mxu0 }
 0x52e   : > { %v6797_v52 = vpop.f32.mrb[33].mxu1  ;;  %v8136_v50 = vld [vmem:[%s7561_s24 + $0x10] sm:$0xff] }
 0x531   : > { %v8105_v41 = vpop.f32.mrb[40].mxu0  ;;  %v8107_v28 = vpop.f32.mrb[34].mxu1 }
 0x532   : > { %v6802_v51 = vpop.f32.mrb[41].mxu0  ;;  %v6807_v22 = vpop.f32.mrb[35].mxu1 }
 0x535   : > { %v8109_v13 = vpop.f32.mrb[42].mxu0 }
 0x536   : > { %8663 = vst [vmem:[#allocation2_spill] sm:$0xff] %v8109_v13  ;;  %v8111_v60 = vpop.f32.mrb[36].mxu1  ;;  %v6812_v62 = vpop.f32.mrb[43].mxu0 }
 0x537   : > { %8664 = vst [vmem:[#allocation11_spill] sm:$0xff] %v8111_v60  ;;  %v6817_v55 = vpop.f32.mrb[37].mxu1 }
 0x53a   : > { %v8113_v57 = vpop.f32.mrb[44].mxu0  ;;  %v8115_v59 = vpop.f32.mrb[38].mxu1 }
 0x53b   : > { %8665 = vst [vmem:[#allocation10_spill] sm:$0xff] %v8113_v57  ;;  %8666 = vst [vmem:[#allocation3_spill] sm:$0xff] %v8115_v59  ;;  %v6822_v27 = vpop.f32.mrb[45].mxu0  ;;  %v6827_v19 = vpop.f32.mrb[39].mxu1 }
 0x53e   : > { %v8117_v42 = vpop.f32.mrb[46].mxu0 }
 0x53f   : > { %8667 = vst [vmem:[#allocation13_spill] sm:$0xff] %v8117_v42  ;;  %v8119_v61 = vpop.f32.mrb[40].mxu1  ;;  %v6832_v6 = vpop.f32.mrb[47].mxu0 }
 0x540   : > { %8668 = vst [vmem:[#allocation5_spill] sm:$0xff] %v8119_v61  ;;  %v6837_v26 = vpop.f32.mrb[41].mxu1 }
 0x543   : > { %v8121_v48 = vpop.f32.mrb[42].mxu1 }
 0x544   : > { %8669 = vst [vmem:[#allocation12_spill] sm:$0xff] %v8121_v48  ;;  %v6847_v21 = vpop.f32.mrb[43].mxu1 }
 0x54a   : > { %v3459_v63 = vpop.f32.mrb[44].mxu1 }
 0x54b   : > { %v4637_v16 = vadd.f32 %v8030_v14, %v3459_v63  ;;  %v6857_v23 = vpop.f32.mrb[45].mxu1 }
 0x54d   : > { %vm4653_vm3 = vcmp.ge.f32.partialorder %v4637_v16, 0.0  ;;  %v4669_v29 = vmul.f32 0.2, %v4637_v16 }
 0x54f   : > { %v4685_v1 = vsel %vm4653_vm3, %v4637_v16, %v4669_v29 }
 0x550   : > { %v8128_v36 = vmul.f32 %v8125_v15, %v4685_v1 }
 0x552   : > { %v4717_v12 = vsel %vm2028_vm5, %v8128_v36, -inf }
 0x553   : > { %4718 = vmax.xlane.f32.xlu0 %v4717_v12 }
 0x56d   : > { %v3607_v32 = vpop.f32.mrb[46].mxu1 }
 0x56e   : > { %v4639_v8 = vadd.f32 %v8045_v38, %v3607_v32  ;;  %v6867_v25 = vpop.f32.mrb[47].mxu1 }
 0x570   : > { %vm4655_vm9 = vcmp.ge.f32.partialorder %v4639_v8, 0.0  ;;  %v4671_v14 = vmul.f32 0.2, %v4639_v8 }
 0x571   : > { %v8133_v11 = vpop.f32.mrb[48].mxu0  ;;  %v3755_v17 = vpop.f32.mrb[48].mxu1 }
 0x572   : > { %8670 = vst [vmem:[#allocation4_spill] sm:$0xff] %v8133_v11  ;;  %v6842_v4 = vpop.f32.mrb[49].mxu0  ;;  %v6877_v49 = vpop.f32.mrb[49].mxu1  ;;  %v4687_v45 = vsel %vm4655_vm9, %v4639_v8, %v4671_v14  ;;  %v4641_v27 = vadd.f32 %v7977_v18, %v3755_v17 }
 0x573   : > { %v8139_v52 = vmul.f32 %v8136_v50, %v4687_v45 }
 0x574   : > { %v4673_v26 = vmul.f32 0.2, %v4641_v27  ;;  %vm4657_vm10 = vcmp.ge.f32.partialorder %v4641_v27, 0.0 }
 0x575   : > { %v8141_v51 = vpop.f32.mrb[50].mxu0  ;;  %v3903_v22 = vpop.f32.mrb[50].mxu1  ;;  %v4723_v38 = vsel %vm2028_vm5, %v8139_v52, -inf }
 0x576   : > { %8671 = vst [vmem:[#allocation7_spill] sm:$0xff] %v8141_v51  ;;  %v6852_v62 = vpop.f32.mrb[51].mxu0  ;;  %4724 = vmax.xlane.f32.xlu0 %v4723_v38  ;;  %v6887_v55 = vpop.f32.mrb[51].mxu1  ;;  %v4643_v63 = vadd.f32 %v7993_v3, %v3903_v22  ;;  %v4689_v18 = vsel %vm4657_vm10, %v4641_v27, %v4673_v26  ;;  %v8151_v3 = vld [vmem:[%s7561_s24 + $0x8] sm:$0xff]  ;;  %v8157_v38 = vld [vmem:[%s7561_s24 + $0x20] sm:$0xff] }
 0x578   : > { %v4675_v25 = vmul.f32 0.2, %v4643_v63  ;;  %vm4659_vm12 = vcmp.ge.f32.partialorder %v4643_v63, 0.0 }
 0x579   : > { %v4051_v19 = vpop.f32.mrb[52].mxu1 }
 0x57a   : > { %v6897_v6 = vpop.f32.mrb[53].mxu1  ;;  %v4645_v32 = vadd.f32 %v8011_v46, %v4051_v19  ;;  %v8160_v46 = vmul.f32 %v8157_v38, %v4689_v18 }
 0x57c   : > { %v3533_v21 = vpop.f32.mrb[52].mxu0  ;;  %v4677_v62 = vmul.f32 0.2, %v4645_v32  ;;  %vm4661_vm14 = vcmp.ge.f32.partialorder %v4645_v32, 0.0 }
 0x57d   : > { %v4638_v16 = vadd.f32 %v7959_v39, %v3533_v21  ;;  %v4199_v23 = vpop.f32.mrb[54].mxu1  ;;  %v6862_v29 = vpop.f32.mrb[53].mxu0 }
 0x57e   : > { %v6907_v1 = vpop.f32.mrb[55].mxu1  ;;  %v8168_v29 = vld [vmem:[%s7561_s24 + $0x18] sm:$0xff] }
 0x57f   : > { %vm4654_vm11 = vcmp.ge.f32.partialorder %v4638_v16, 0.0  ;;  %v4670_v12 = vmul.f32 0.2, %v4638_v16 }
 0x580   : > { %v3681_v8 = vpop.f32.mrb[54].mxu0 }
 0x581   : > { %v4640_v14 = vadd.f32 %v8056_v20, %v3681_v8  ;;  %v4347_v17 = vpop.f32.mrb[56].mxu1  ;;  %v6872_v4 = vpop.f32.mrb[55].mxu0  ;;  %v4686_v49 = vsel %vm4654_vm11, %v4638_v16, %v4670_v12  ;;  %v4647_v20 = vadd.f32 %v8034_v34, %v4199_v23  ;;  %v4691_v16 = vsel %vm4659_vm12, %v4643_v63, %v4675_v25 }
 0x582   : > { %v8154_v39 = vmul.f32 %v8151_v3, %v4686_v49  ;;  %v6917_v45 = vpop.f32.mrb[57].mxu1  ;;  %v4729_v12 = vsel %vm2028_vm5, %v8160_v46, -inf  ;;  %v4693_v25 = vsel %vm4661_vm14, %v4645_v32, %v4677_v62  ;;  %v4649_v4 = vadd.f32 %v8050_v47, %v4347_v17 }
 0x583   : > { %vm4656_vm13 = vcmp.ge.f32.partialorder %v4640_v14, 0.0  ;;  %v4672_v22 = vmul.f32 0.2, %v4640_v14  ;;  %v4679_v8 = vmul.f32 0.2, %v4647_v20  ;;  %vm4663_vm0 = vcmp.ge.f32.partialorder %v4647_v20, 0.0 }
 0x584   : > { %v3829_v55 = vpop.f32.mrb[56].mxu0  ;;  %v4720_v27 = vsel %vm2028_vm5, %v8154_v39, -inf  ;;  %vm4665_vm6 = vcmp.ge.f32.partialorder %v4649_v4, 0.0 }
 0x585   : > { %v4642_v19 = vadd.f32 %v8065_v2, %v3829_v55  ;;  %4721 = vmax.xlane.f32.xlu1 %v4720_v27  ;;  %v4495_v6 = vpop.f32.mrb[58].mxu1  ;;  %v6882_v26 = vpop.f32.mrb[57].mxu0  ;;  %v4688_v21 = vsel %vm4656_vm13, %v4640_v14, %v4672_v22  ;;  %v8178_v14 = vld [vmem:[%s7561_s24 + $0x30] sm:$0xff]  ;;  %v8187_v55 = vld [vmem:[%s7561_s24 + $0x28] sm:$0xff]  ;;  %v4695_v62 = vsel %vm4663_vm0, %v4647_v20, %v4679_v8 }
 0x586   : > { %v8171_v1 = vmul.f32 %v8168_v29, %v4688_v21  ;;  %v6927_v34 = vpop.f32.mrb[59].mxu1  ;;  %v8181_v63 = vmul.f32 %v8178_v14, %v4691_v16  ;;  %v4651_v16 = vadd.f32 %v8069_v43, %v4495_v6 }
 0x587   : > { %vm4658_vm15 = vcmp.ge.f32.partialorder %v4642_v19, 0.0  ;;  %v4674_v23 = vmul.f32 0.2, %v4642_v19 }
 0x588   : > { %v3977_v2 = vpop.f32.mrb[58].mxu0  ;;  %v4726_v18 = vsel %vm2028_vm5, %v8171_v1, -inf  ;;  %v4735_v47 = vsel %vm2028_vm5, %v8181_v63, -inf  ;;  %vm4667_vm8 = vcmp.ge.f32.partialorder %v4651_v16, 0.0 }
 0x589   : > { %v4644_v49 = vadd.f32 %v8076_v37, %v3977_v2  ;;  %4727 = vmax.xlane.f32.xlu0 %v4726_v18  ;;  %4730 = vmax.xlane.f32.xlu1 %v4729_v12  ;;  %v6892_v45 = vpop.f32.mrb[59].mxu0  ;;  %v4690_v22 = vsel %vm4658_vm15, %v4642_v19, %v4674_v23  ;;  %v8197_v37 = vld [vmem:[%s7561_s24 + $0x40] sm:$0xff]  ;;  %v4681_v19 = vmul.f32 0.2, %v4649_v4  ;;  %v8206_v2 = vld [vmem:[%s7561_s24 + $0x38] sm:$0xff] }
 0x58a   : > { %v8190_v27 = vmul.f32 %v8187_v55, %v4690_v22  ;;  %v8200_v17 = vmul.f32 %v8197_v37, %v4693_v25 }
 0x58b   : > { %vm4660_vm4 = vcmp.ge.f32.partialorder %v4644_v49, 0.0  ;;  %v4676_v26 = vmul.f32 0.2, %v4644_v49 }
 0x58c   : > { %v4125_v21 = vpop.f32.mrb[60].mxu0  ;;  %v4732_v32 = vsel %vm2028_vm5, %v8190_v27, -inf  ;;  %v4741_v43 = vsel %vm2028_vm5, %v8200_v17, -inf }
 0x58d   : > { %v4646_v34 = vadd.f32 %v8083_v9, %v4125_v21  ;;  %4733 = vmax.xlane.f32.xlu0 %v4732_v32  ;;  %4736 = vmax.xlane.f32.xlu1 %v4735_v47  ;;  %v6902_v23 = vpop.f32.mrb[61].mxu0  ;;  %v4692_v12 = vsel %vm4660_vm4, %v4644_v49, %v4676_v26  ;;  %v8216_v9 = vld [vmem:[%s7561_s24 + $0x50] sm:$0xff]  ;;  %v4683_v49 = vmul.f32 0.2, %v4651_v16  ;;  %v4697_v21 = vsel %vm4665_vm6, %v4649_v4, %v4681_v19  ;;  %v8224_v32 = vld [vmem:[%s7561_s24 + $0x48] sm:$0xff] }
 0x58e   : > { %v8209_v18 = vmul.f32 %v8206_v2, %v4692_v12  ;;  %v8219_v6 = vmul.f32 %v8216_v9, %v4695_v62 }
 0x58f   : > { %vm4662_vm7 = vcmp.ge.f32.partialorder %v4646_v34, 0.0  ;;  %v4678_v25 = vmul.f32 0.2, %v4646_v34 }
 0x590   : > { %v4273_v20 = vpop.f32.mrb[62].mxu0  ;;  %v4738_v8 = vsel %vm2028_vm5, %v8209_v18, -inf }
 0x591   : > { %v4648_v45 = vadd.f32 %v8088_v5, %v4273_v20  ;;  %4739 = vmax.xlane.f32.xlu0 %v4738_v8  ;;  %4742 = vmax.xlane.f32.xlu1 %v4741_v43  ;;  %v6912_v22 = vpop.f32.mrb[63].mxu0  ;;  %v4694_v26 = vsel %vm4662_vm7, %v4646_v34, %v4678_v25  ;;  %v4747_v5 = vsel %vm2028_vm5, %v8219_v6, -inf  ;;  %v8234_v34 = vld [vmem:[%s7561_s24 + $0x60] sm:$0xff]  ;;  %v4699_v8 = vsel %vm4667_vm8, %v4651_v16, %v4683_v49  ;;  %v8241_v43 = vld [vmem:[%s7561_s24 + $0x58] sm:$0xff] }
 0x592   : > { %v8227_v47 = vmul.f32 %v8224_v32, %v4694_v26  ;;  %v8237_v4 = vmul.f32 %v8234_v34, %v4697_v21 }
 0x593   : > { %vm4664_vm3 = vcmp.ge.f32.partialorder %v4648_v45, 0.0  ;;  %v4680_v62 = vmul.f32 0.2, %v4648_v45 }
 0x594   : > { %v4421_v23 = vpop.f32.mrb[64].mxu0  ;;  %v4744_v12 = vsel %vm2028_vm5, %v8227_v47, -inf }
 0x595   : > { %v4650_v19 = vadd.f32 %v8090_v40, %v4421_v23  ;;  %4745 = vmax.xlane.f32.xlu0 %v4744_v12  ;;  %4748 = vmax.xlane.f32.xlu1 %v4747_v5  ;;  %v6922_v25 = vpop.f32.mrb[65].mxu0  ;;  %v4696_v20 = vsel %vm4664_vm3, %v4648_v45, %v4680_v62  ;;  %v4753_v40 = vsel %vm2028_vm5, %v8237_v4, -inf  ;;  %v8251_v23 = vld [vmem:[%s7561_s24 + $0x70] sm:$0xff]  ;;  %v8258_v12 = vld [vmem:[%s7561_s24 + $0x68] sm:$0xff] }
 0x596   : > { %v8244_v22 = vmul.f32 %v8241_v43, %v4696_v20  ;;  %v8254_v45 = vmul.f32 %v8251_v23, %v4699_v8 }
 0x597   : > { %vm4666_vm9 = vcmp.ge.f32.partialorder %v4650_v19, 0.0  ;;  %v4682_v26 = vmul.f32 0.2, %v4650_v19 }
 0x598   : > { %v4569_v51 = vpop.f32.mrb[66].mxu0  ;;  %v4750_v21 = vsel %vm2028_vm5, %v8244_v22, -inf  ;;  %v4759_v8 = vsel %vm2028_vm5, %v8254_v45, -inf }
 0x599   : > { %v4652_v16 = vadd.f32 %v8092_v33, %v4569_v51  ;;  %4751 = vmax.xlane.f32.xlu0 %v4750_v21  ;;  %4754 = vmax.xlane.f32.xlu1 %v4753_v40  ;;  %v4698_v49 = vsel %vm4666_vm9, %v4650_v19, %v4682_v26  ;;  %v6932_v62 = vpop.f32.mrb[67].mxu0  ;;  %v8268_v51 = vld [vmem:[%s7561_s24 + $0x78] sm:$0xff]  ;;  %v8283_v21 = vpop.permute.xlu0 %5213 }
 0x59a   : > { %v8261_v5 = vmul.f32 %v8258_v12, %v4698_v49 }
 0x59b   : > { %vm4668_vm10 = vcmp.ge.f32.partialorder %v4652_v16, 0.0  ;;  %v4684_v25 = vmul.f32 0.2, %v4652_v16 }
 0x59c   : > { %v4756_v20 = vsel %vm2028_vm5, %v8261_v5, -inf }
 0x59d   : > { %4757 = vmax.xlane.f32.xlu0 %v4756_v20  ;;  %4760 = vmax.xlane.f32.xlu1 %v4759_v8  ;;  %v4700_v33 = vsel %vm4668_vm10, %v4652_v16, %v4684_v25  ;;  %v8285_v40 = vpop.permute.xlu0 %5365 }
 0x59e   : > { %v8271_v19 = vmul.f32 %v8268_v51, %v4700_v33 }
 0x5a0   : > { %v4762_v26 = vsel %vm2028_vm5, %v8271_v19, -inf }
 0x5a1   : > { %4763 = vmax.xlane.f32.xlu0 %v4762_v26  ;;  %v8287_v16 = vpop.permute.xlu0 %5517 }
 0x5ae   : > { %5745 = vrot.lane.b32.xlu1 %v8655_v58, %s7213_s26 }
 0x5b2   : > { %5897 = vrot.lane.b32.xlu1 %v8657_v24, %s7213_s26 }
 0x5b7   : > { %5669 = vrot.lane.b32.xlu0 %v8653_v31, %s7213_s26  ;;  %v8294_v31 = vpop.permute.xlu1 %5061 }
 0x5bb   : > { %5821 = vrot.lane.b32.xlu0 %v8656_v7, %s7213_s26  ;;  %v8296_v7 = vpop.permute.xlu1 %5137 }
 0x5bf   : > { %v8298_v20 = vpop.permute.xlu1 %5289 }
 0x5c3   : > { %v8301_v48 = vpop.permute.xlu1 %5441 }
 0x5e0   : > { %v4719_v49 = vpop.xlane.xlu0 %4718 }
 0x5e1   : > { %v4765_v62 = vsub.f32 %v8128_v36, %v4719_v49  ;;  %v8303_v36 = vpop.permute.xlu1 %5593 }
 0x5e3   : > { %v4781_v25 = vmul.f32 1.442695, %v4765_v62 }
 0x5e5   : > { %7118 = vpow2.f32 %v4781_v25 }
 0x5ef   : > { %v8290_v58 = vpop.eup %7118 }
 0x5f0   : > { %v4813_v24 = vsel %vm2028_vm5, %v8290_v58, 0.0 }
 0x5f1   : > { %4814 = vadd.xlane.f32.xlu1 %v4813_v24 }
 0x603   : > { %v4725_v8 = vpop.xlane.xlu0 %4724 }
 0x604   : > { %v4767_v33 = vsub.f32 %v8139_v52, %v4725_v8 }
 0x606   : > { %v4785_v26 = vmul.f32 1.442695, %v4767_v33 }
 0x608   : > { %7120 = vpow2.f32 %v4785_v26 }
 0x612   : > { %v8305_v49 = vpop.eup %7120  ;;  %v4722_v62 = vpop.xlane.xlu1 %4721 }
 0x613   : > { %v4766_v25 = vsub.f32 %v8154_v39, %v4722_v62  ;;  %v4819_v24 = vsel %vm2028_vm5, %v8305_v49, 0.0 }
 0x614   : > { %4820 = vadd.xlane.f32.xlu1 %v4819_v24 }
 0x615   : > { %v4783_v11 = vmul.f32 1.442695, %v4766_v25 }
 0x616   : > { %v4728_v61 = vpop.xlane.xlu0 %4727  ;;  %v4731_v42 = vpop.xlane.xlu1 %4730 }
 0x617   : > { %7122 = vpow2.f32 %v4783_v11  ;;  %v4768_v52 = vsub.f32 %v8171_v1, %v4728_v61  ;;  %v4769_v8 = vsub.f32 %v8160_v46, %v4731_v42 }
 0x619   : > { %v4787_v33 = vmul.f32 1.442695, %v4768_v52  ;;  %v4789_v26 = vmul.f32 1.442695, %v4769_v8 }
 0x61a   : > { %v4734_v59 = vpop.xlane.xlu0 %4733  ;;  %v4737_v57 = vpop.xlane.xlu1 %4736 }
 0x61b   : > { %7124 = vpow2.f32 %v4787_v33  ;;  %v4770_v60 = vsub.f32 %v8190_v27, %v4734_v59  ;;  %v4771_v39 = vsub.f32 %v8181_v63, %v4737_v57 }
 0x61c   : > { %7126 = vpow2.f32 %v4789_v26 }
 0x61d   : > { %v4791_v62 = vmul.f32 1.442695, %v4770_v60  ;;  %v4793_v24 = vmul.f32 1.442695, %v4771_v39 }
 0x61e   : > { %v4740_v25 = vpop.xlane.xlu0 %4739  ;;  %v4743_v13 = vpop.xlane.xlu1 %4742 }
 0x61f   : > { %7128 = vpow2.f32 %v4791_v62  ;;  %v4772_v11 = vsub.f32 %v8209_v18, %v4740_v25  ;;  %v4773_v61 = vsub.f32 %v8200_v17, %v4743_v13 }
 0x620   : > { %7130 = vpow2.f32 %v4793_v24 }
 0x621   : > { %v8316_v42 = vpop.eup %7122  ;;  %v4795_v46 = vmul.f32 1.442695, %v4772_v11  ;;  %v4797_v1 = vmul.f32 1.442695, %v4773_v61 }
 0x622   : > { %v4746_v52 = vpop.xlane.xlu0 %4745  ;;  %v4749_v8 = vpop.xlane.xlu1 %4748  ;;  %v4816_v57 = vsel %vm2028_vm5, %v8316_v42, 0.0 }
 0x623   : > { %7132 = vpow2.f32 %v4795_v46  ;;  %v4774_v60 = vsub.f32 %v8227_v47, %v4746_v52  ;;  %v4775_v59 = vsub.f32 %v8219_v6, %v4749_v8  ;;  %4817 = vadd.xlane.f32.xlu0 %v4816_v57 }
 0x624   : > { %7134 = vpow2.f32 %v4797_v1 }
 0x625   : > { %v8322_v63 = vpop.eup %7124  ;;  %v4799_v13 = vmul.f32 1.442695, %v4774_v60  ;;  %v4801_v27 = vmul.f32 1.442695, %v4775_v59 }
 0x626   : > { %v8324_v17 = vpop.eup %7126  ;;  %v4752_v18 = vpop.xlane.xlu0 %4751  ;;  %v4822_v26 = vsel %vm2028_vm5, %v8322_v63, 0.0 }
 0x627   : > { %v4755_v33 = vpop.xlane.xlu1 %4754  ;;  %7136 = vpow2.f32 %v4799_v13  ;;  %v4776_v39 = vsub.f32 %v8244_v22, %v4752_v18  ;;  %4823 = vadd.xlane.f32.xlu0 %v4822_v26  ;;  %v4825_v6 = vsel %vm2028_vm5, %v8324_v17, 0.0 }
 0x628   : > { %v4777_v47 = vsub.f32 %v8237_v4, %v4755_v33  ;;  %7138 = vpow2.f32 %v4801_v27  ;;  %4826 = vadd.xlane.f32.xlu1 %v4825_v6 }
 0x629   : > { %v8332_v62 = vpop.eup %7128  ;;  %v4803_v24 = vmul.f32 1.442695, %v4776_v39 }
 0x62a   : > { %v4805_v25 = vmul.f32 1.442695, %v4777_v47  ;;  %v8334_v11 = vpop.eup %7130  ;;  %v4758_v61 = vpop.xlane.xlu0 %4757  ;;  %v4828_v1 = vsel %vm2028_vm5, %v8332_v62, 0.0 }
 0x62b   : > { %v4761_v46 = vpop.xlane.xlu1 %4760  ;;  %7140 = vpow2.f32 %v4803_v24  ;;  %v4778_v4 = vsub.f32 %v8261_v5, %v4758_v61  ;;  %4829 = vadd.xlane.f32.xlu0 %v4828_v1  ;;  %v4831_v52 = vsel %vm2028_vm5, %v8334_v11, 0.0 }
 0x62c   : > { %v4779_v22 = vsub.f32 %v8254_v45, %v4761_v46  ;;  %7142 = vpow2.f32 %v4805_v25  ;;  %4832 = vadd.xlane.f32.xlu1 %v4831_v52 }
 0x62d   : > { %v8342_v8 = vpop.eup %7132  ;;  %v4807_v57 = vmul.f32 1.442695, %v4778_v4 }
 0x62e   : > { %v4809_v60 = vmul.f32 1.442695, %v4779_v22  ;;  %v8344_v59 = vpop.eup %7134  ;;  %v4764_v13 = vpop.xlane.xlu0 %4763  ;;  %v4834_v27 = vsel %vm2028_vm5, %v8342_v8, 0.0 }
 0x62f   : > { %7144 = vpow2.f32 %v4807_v57  ;;  %v4780_v5 = vsub.f32 %v8271_v19, %v4764_v13  ;;  %4835 = vadd.xlane.f32.xlu0 %v4834_v27  ;;  %v4837_v45 = vsel %vm2028_vm5, %v8344_v59, 0.0  ;;  %v8383_v57 = vpop.permute.xlu1 %5745 }
 0x630   : > { %7146 = vpow2.f32 %v4809_v60  ;;  %4838 = vadd.xlane.f32.xlu1 %v4837_v45 }
 0x631   : > { %v8351_v18 = vpop.eup %7136  ;;  %v4811_v33 = vmul.f32 1.442695, %v4780_v5 }
 0x632   : > { %v8353_v26 = vpop.eup %7138  ;;  %v4840_v39 = vsel %vm2028_vm5, %v8351_v18, 0.0 }
 0x633   : > { %7148 = vpow2.f32 %v4811_v33  ;;  %4841 = vadd.xlane.f32.xlu0 %v4840_v39  ;;  %v4843_v47 = vsel %vm2028_vm5, %v8353_v26, 0.0  ;;  %v8385_v60 = vpop.permute.xlu1 %5897 }
 0x634   : > { %4844 = vadd.xlane.f32.xlu1 %v4843_v47 }
 0x635   : > { %v8359_v19 = vpop.eup %7140 }
 0x636   : > { %v8361_v6 = vpop.eup %7142  ;;  %v4846_v24 = vsel %vm2028_vm5, %v8359_v19, 0.0 }
 0x637   : > { %4847 = vadd.xlane.f32.xlu0 %v4846_v24  ;;  %v4849_v25 = vsel %vm2028_vm5, %v8361_v6, 0.0 }
 0x638   : > { %4850 = vadd.xlane.f32.xlu1 %v4849_v25 }
 0x639   : > { %v8367_v61 = vpop.eup %7144 }
 0x63a   : > { %v8369_v46 = vpop.eup %7146  ;;  %v4852_v1 = vsel %vm2028_vm5, %v8367_v61, 0.0 }
 0x63b   : > { %4853 = vadd.xlane.f32.xlu0 %v4852_v1  ;;  %v4855_v4 = vsel %vm2028_vm5, %v8369_v46, 0.0 }
 0x63c   : > { %4856 = vadd.xlane.f32.xlu1 %v4855_v4 }
 0x63d   : > { %v8375_v22 = vpop.eup %7148 }
 0x63e   : > { %v4858_v52 = vsel %vm2028_vm5, %v8375_v22, 0.0 }
 0x63f   : > { %4859 = vadd.xlane.f32.xlu0 %v4858_v52 }
 0x64d   : > { %6049 = vrot.lane.b32.xlu1 %v8661_v10, %s7213_s26  ;;  %v8394_v10 = vpop.permute.xlu0 %5669 }
 0x651   : > { %v8396_v39 = vpop.permute.xlu0 %5821 }
 0x655   : > { %5973 = vrot.lane.b32.xlu0 %v8658_v53, %s7213_s26 }
 0x67e   : > { %v4815_v13 = vpop.xlane.xlu1 %4814 }
 0x67f   : > { %7150 = vrcp.f32 %v4815_v13 }
 0x689   : > { %v7151_v27 = vpop.eup %7150 }
 0x68a   : > { %v4862_v5 = vmul.f32 %v7151_v27, %v8290_v58 }
 0x68c   : > { %v4893_v45 = vmul.f32 %v8125_v15, %v4862_v5 }
 0x68e   : > { %6936 = vmatmul.mubr.msk.f32.vlgmr.msra.gmra.mrb[60].mxu1 %vm2028_vm5, %v4893_v45 }
 0x68f   : > { %6944 = vmatpush3.msra.mxu1 %v8294_v31  ;;  %6945 = vmatprep.mubr.msk.f32.mxu1 %vm7208_vm2, %v8647_v0 }
 0x690   : > { %6953 = vmatprep.subr.mxu1 %v8647_v0 }
 0x6a1   : > { %v4821_v53 = vpop.xlane.xlu1 %4820 }
 0x6a2   : > { %7152 = vrcp.f32 %v4821_v53 }
 0x6ac   : > { %v7153_v33 = vpop.eup %7152 }
 0x6ad   : > { %v4866_v58 = vmul.f32 %v7153_v33, %v8305_v49 }
 0x6af   : > { %v4895_v15 = vmul.f32 %v8136_v50, %v4866_v58 }
 0x6b0   : > { %v4818_v47 = vpop.xlane.xlu0 %4817 }
 0x6b1   : > { %7154 = vrcp.f32 %v4818_v47  ;;  %6946 = vmatmul.mubr.msk.f32.vlgmr.msra.gmra.mrb[62].mxu1 %vm2028_vm5, %v4895_v15 }
 0x6b2   : > { %6954 = vmatpush3.msra.mxu1 %v8283_v21  ;;  %6955 = vmatprep.mubr.msk.f32.mxu1 %vm7208_vm2, %v8647_v0 }
 0x6b3   : > { %6963 = vmatprep.subr.mxu1 %v8647_v0 }
 0x6b4   : > { %v4824_v31 = vpop.xlane.xlu0 %4823 }
 0x6b5   : > { %7156 = vrcp.f32 %v4824_v31  ;;  %v4827_v24 = vpop.xlane.xlu1 %4826 }
 0x6b6   : > { %7158 = vrcp.f32 %v4827_v24 }
 0x6b8   : > { %v4830_v25 = vpop.xlane.xlu0 %4829 }
 0x6b9   : > { %7160 = vrcp.f32 %v4830_v25  ;;  %v4833_v49 = vpop.xlane.xlu1 %4832 }
 0x6ba   : > { %7162 = vrcp.f32 %v4833_v49 }
 0x6bb   : > { %v7155_v50 = vpop.eup %7154 }
 0x6bc   : > { %v4864_v1 = vmul.f32 %v7155_v50, %v8316_v42  ;;  %v4836_v4 = vpop.xlane.xlu0 %4835 }
 0x6bd   : > { %7164 = vrcp.f32 %v4836_v4  ;;  %v4839_v52 = vpop.xlane.xlu1 %4838 }
 0x6be   : > { %7166 = vrcp.f32 %v4839_v52  ;;  %v4894_v21 = vmul.f32 %v8151_v3, %v4864_v1 }
 0x6bf   : > { %v7157_v13 = vpop.eup %7156 }
 0x6c0   : > { %v7159_v27 = vpop.eup %7158  ;;  %v4868_v5 = vmul.f32 %v7157_v13, %v8322_v63  ;;  %6941 = vmatmul.mubr.msk.f32.vlgmr.msra.gmra.mrb[68].mxu0 %vm2028_vm5, %v4894_v21  ;;  %v4842_v45 = vpop.xlane.xlu0 %4841 }
 0x6c1   : > { %v4870_v53 = vmul.f32 %v7159_v27, %v8324_v17  ;;  %6949 = vmatpush3.msra.mxu0 %v8296_v7  ;;  %7168 = vrcp.f32 %v4842_v45  ;;  %v4845_v33 = vpop.xlane.xlu1 %4844  ;;  %6950 = vmatprep.mubr.msk.f32.mxu0 %vm7208_vm2, %v8647_v0 }
 0x6c2   : > { %7170 = vrcp.f32 %v4845_v33  ;;  %6958 = vmatprep.subr.mxu0 %v8647_v0  ;;  %v4896_v3 = vmul.f32 %v8168_v29, %v4868_v5 }
 0x6c3   : > { %v7161_v42 = vpop.eup %7160  ;;  %v4897_v63 = vmul.f32 %v8157_v38, %v4870_v53 }
 0x6c4   : > { %v7163_v58 = vpop.eup %7162  ;;  %v4872_v15 = vmul.f32 %v7161_v42, %v8332_v62  ;;  %6951 = vmatmul.mubr.msk.f32.vlgmr.msra.gmra.mrb[70].mxu0 %vm2028_vm5, %v4896_v3  ;;  %v4848_v17 = vpop.xlane.xlu0 %4847 }
 0x6c5   : > { %v4874_v7 = vmul.f32 %v7163_v58, %v8334_v11  ;;  %6959 = vmatpush3.msra.mxu0 %v8298_v20  ;;  %7172 = vrcp.f32 %v4848_v17  ;;  %6956 = vmatmul.mubr.msk.f32.vlgmr.msra.gmra.mrb[64].mxu1 %vm2028_vm5, %v4897_v63  ;;  %v4851_v47 = vpop.xlane.xlu1 %4850 }
 0x6c6   : > { %6964 = vmatpush3.msra.mxu1 %v8285_v40  ;;  %7174 = vrcp.f32 %v4851_v47  ;;  %6960 = vmatprep.mubr.msk.f32.mxu0 %vm7208_vm2, %v8647_v0  ;;  %v4898_v38 = vmul.f32 %v8187_v55, %v4872_v15 }
 0x6c7   : > { %v7165_v29 = vpop.eup %7164  ;;  %6965 = vmatprep.mubr.msk.f32.mxu1 %vm7208_vm2, %v8647_v0  ;;  %6968 = vmatprep.subr.mxu0 %v8647_v0  ;;  %v4899_v20 = vmul.f32 %v8178_v14, %v4874_v7 }
 0x6c8   : > { %v7167_v62 = vpop.eup %7166  ;;  %v4876_v11 = vmul.f32 %v7165_v29, %v8342_v8  ;;  %6973 = vmatprep.subr.mxu1 %v8647_v0  ;;  %6961 = vmatmul.mubr.msk.f32.vlgmr.msra.gmra.mrb[72].mxu0 %vm2028_vm5, %v4898_v38  ;;  %v4854_v40 = vpop.xlane.xlu0 %4853 }
 0x6c9   : > { %v4878_v31 = vmul.f32 %v7167_v62, %v8344_v59  ;;  %6969 = vmatpush3.msra.mxu0 %v8301_v48  ;;  %7176 = vrcp.f32 %v4854_v40  ;;  %6966 = vmatmul.mubr.msk.f32.vlgmr.msra.gmra.mrb[66].mxu1 %vm2028_vm5, %v4899_v20  ;;  %v4857_v55 = vpop.xlane.xlu1 %4856 }
 0x6ca   : > { %6974 = vmatpush3.msra.mxu1 %v8287_v16  ;;  %7178 = vrcp.f32 %v4857_v55  ;;  %6970 = vmatprep.mubr.msk.f32.mxu0 %vm7208_vm2, %v8647_v0  ;;  %v4900_v14 = vmul.f32 %v8206_v2, %v4876_v11 }
 0x6cb   : > { %v7169_v8 = vpop.eup %7168  ;;  %6975 = vmatprep.mubr.msk.f32.mxu1 %vm7208_vm2, %v8647_v0  ;;  %6978 = vmatprep.subr.mxu0 %v8647_v0  ;;  %v4901_v48 = vmul.f32 %v8197_v37, %v4878_v31 }
 0x6cc   : > { %v7171_v59 = vpop.eup %7170  ;;  %v4880_v24 = vmul.f32 %v7169_v8, %v8351_v18  ;;  %6983 = vmatprep.subr.mxu1 %v8647_v0  ;;  %6971 = vmatmul.mubr.msk.f32.vlgmr.msra.gmra.mrb[74].mxu0 %vm2028_vm5, %v4900_v14  ;;  %v4860_v16 = vpop.xlane.xlu0 %4859  ;;  %v8510_v8 = vld [vmem:[%s8605_s4] ss:$0 sm:$0xff] }
 0x6cd   : > { %v4882_v25 = vmul.f32 %v7171_v59, %v8353_v26  ;;  %6979 = vmatpush3.msra.mxu0 %v8303_v36  ;;  %7180 = vrcp.f32 %v4860_v16  ;;  %6976 = vmatmul.mubr.msk.f32.vlgmr.msra.gmra.mrb[68].mxu1 %vm2028_vm5, %v4901_v48  ;;  %v6050_v50 = vpop.permute.xlu1 %6049 }
 0x6ce   : > { %6984 = vmatpush3.msra.mxu1 %v8394_v10  ;;  %6980 = vmatprep.mubr.msk.f32.mxu0 %vm7208_vm2, %v8647_v0  ;;  %v4902_v37 = vmul.f32 %v8224_v32, %v4880_v24 }
 0x6cf   : > { %v7173_v2 = vpop.eup %7172  ;;  %6985 = vmatprep.mubr.msk.f32.mxu1 %vm7208_vm2, %v8647_v0  ;;  %6988 = vmatprep.subr.mxu0 %v8647_v0  ;;  %v4903_v18 = vmul.f32 %v8216_v9, %v4882_v25 }
 0x6d0   : > { %v7175_v26 = vpop.eup %7174  ;;  %v4884_v36 = vmul.f32 %v7173_v2, %v8359_v19  ;;  %6993 = vmatprep.subr.mxu1 %v8647_v0  ;;  %6981 = vmatmul.mubr.msk.f32.vlgmr.msra.gmra.mrb[76].mxu0 %vm2028_vm5, %v4902_v37 }
 0x6d1   : > { %v4886_v10 = vmul.f32 %v7175_v26, %v8361_v6  ;;  %6986 = vmatmul.mubr.msk.f32.vlgmr.msra.gmra.mrb[70].mxu1 %vm2028_vm5, %v4903_v18  ;;  %6989 = vmatpush3.msra.mxu0 %v8383_v57 }
 0x6d2   : > { %6994 = vmatpush3.msra.mxu1 %v8396_v39  ;;  %6990 = vmatprep.mubr.msk.f32.mxu0 %vm7208_vm2, %v8647_v0  ;;  %v4904_v9 = vmul.f32 %v8241_v43, %v4884_v36  ;;  %v5974_v39 = vpop.permute.xlu0 %5973 }
 0x6d3   : > { %v7177_v32 = vpop.eup %7176  ;;  %6995 = vmatprep.mubr.msk.f32.mxu1 %vm7208_vm2, %v8647_v0  ;;  %6998 = vmatprep.subr.mxu0 %v8647_v0  ;;  %v4905_v19 = vmul.f32 %v8234_v34, %v4886_v10 }
 0x6d4   : > { %v7179_v6 = vpop.eup %7178  ;;  %v4888_v49 = vmul.f32 %v7177_v32, %v8367_v61  ;;  %7003 = vmatprep.subr.mxu1 %v8647_v0  ;;  %6991 = vmatmul.mubr.msk.f32.vlgmr.msra.gmra.mrb[78].mxu0 %vm2028_vm5, %v4904_v9 }
 0x6d5   : > { %v4890_v57 = vmul.f32 %v7179_v6, %v8369_v46  ;;  %6996 = vmatmul.mubr.msk.f32.vlgmr.msra.gmra.mrb[72].mxu1 %vm2028_vm5, %v4905_v19  ;;  %6999 = vmatpush3.msra.mxu0 %v8385_v60 }
 0x6d6   : > { %7004 = vmatpush3.msra.mxu1 %v5974_v39  ;;  %7000 = vmatprep.mubr.msk.f32.mxu0 %vm7208_vm2, %v8647_v0  ;;  %v4906_v34 = vmul.f32 %v8258_v12, %v4888_v49  ;;  %v8672_v39 = vld [vmem:[#allocation2_spill] sm:$0xff] }
 0x6d7   : > { %v7181_v43 = vpop.eup %7180  ;;  %7005 = vmatprep.mubr.msk.f32.mxu1 %vm7208_vm2, %v8647_v0  ;;  %7008 = vmatprep.subr.mxu0 %v8647_v0  ;;  %v4907_v61 = vmul.f32 %v8251_v23, %v4890_v57 }
 0x6d8   : > { %v4892_v46 = vmul.f32 %v7181_v43, %v8375_v22  ;;  %7001 = vmatmul.mubr.msk.f32.vlgmr.msra.gmra.mrb[80].mxu0 %vm2028_vm5, %v4906_v34 }
 0x6d9   : > { %7006 = vmatmul.mubr.msk.f32.vlgmr.msra.gmra.mrb[74].mxu1 %vm2028_vm5, %v4907_v61  ;;  %7009 = vmatpush3.msra.mxu0 %v6050_v50  ;;  %v8673_v61 = vld [vmem:[#allocation11_spill] sm:$0xff] }
 0x6da   : > { %7010 = vmatprep.mubr.msk.f32.mxu0 %vm7208_vm2, %v8647_v0  ;;  %v4908_v12 = vmul.f32 %v8268_v51, %v4892_v46  ;;  %vm6189_vm2 = vcmask 261120  }
 0x6dc   : > { %7011 = vmatmul.mubr.msk.f32.vlgmr.msra.gmra.mrb[82].mxu0 %vm2028_vm5, %v4908_v12  ;;  %v8674_v12 = vld [vmem:[#allocation10_spill] sm:$0xff] }
 0x761   : > { %v4981_v60 = vpop.f32.mrb[60].mxu1 }
 0x762   : > { %6141 = vrot.lane.b32.xlu0 %v4981_v60, %s7214_s27  ;;  %v6937_v23 = vpop.f32.mrb[61].mxu1 }
 0x784   : > { %v5133_v1 = vpop.f32.mrb[62].mxu1 }
 0x785   : > { %6145 = vrot.lane.b32.xlu0 %v5133_v1, %s7214_s27  ;;  %v6947_v22 = vpop.f32.mrb[63].mxu1 }
 0x786   : > { %v8675_v22 = vld [vmem:[#allocation3_spill] sm:$0xff] }
 0x793   : > { %v5057_v4 = vpop.f32.mrb[68].mxu0 }
 0x794   : > { %v6942_v52 = vpop.f32.mrb[69].mxu0  ;;  %6143 = vrot.lane.b32.xlu1 %v5057_v4, %s7214_s27 }
 0x797   : > { %v5209_v21 = vpop.f32.mrb[70].mxu0 }
 0x798   : > { %v5285_v13 = vpop.f32.mrb[64].mxu1  ;;  %v6952_v0 = vpop.f32.mrb[71].mxu0  ;;  %6147 = vrot.lane.b32.xlu1 %v5209_v21, %s7214_s27 }
 0x799   : > { %6149 = vrot.lane.b32.xlu0 %v5285_v13, %s7214_s27  ;;  %v6957_v51 = vpop.f32.mrb[65].mxu1  ;;  %v8676_v13 = vld [vmem:[#allocation13_spill] sm:$0xff] }
 0x79b   : > { %v5361_v27 = vpop.f32.mrb[72].mxu0 }
 0x79c   : > { %v5437_v5 = vpop.f32.mrb[66].mxu1  ;;  %v6962_v45 = vpop.f32.mrb[73].mxu0  ;;  %6151 = vrot.lane.b32.xlu1 %v5361_v27, %s7214_s27 }
 0x79d   : > { %6153 = vrot.lane.b32.xlu0 %v5437_v5, %s7214_s27  ;;  %v6967_v53 = vpop.f32.mrb[67].mxu1  ;;  %v8677_v5 = vld [vmem:[#allocation5_spill] sm:$0xff] }
 0x79f   : > { %v5513_v33 = vpop.f32.mrb[74].mxu0 }
 0x7a0   : > { %v5589_v3 = vpop.f32.mrb[68].mxu1  ;;  %v6972_v42 = vpop.f32.mrb[75].mxu0  ;;  %6155 = vrot.lane.b32.xlu1 %v5513_v33, %s7214_s27 }
 0x7a1   : > { %6157 = vrot.lane.b32.xlu0 %v5589_v3, %s7214_s27  ;;  %v6977_v63 = vpop.f32.mrb[69].mxu1  ;;  %v8678_v3 = vld [vmem:[#allocation4_spill] sm:$0xff] }
 0x7a3   : > { %v5665_v58 = vpop.f32.mrb[76].mxu0 }
 0x7a4   : > { %v5741_v15 = vpop.f32.mrb[70].mxu1  ;;  %v6982_v17 = vpop.f32.mrb[77].mxu0  ;;  %6159 = vrot.lane.b32.xlu1 %v5665_v58, %s7214_s27 }
 0x7a5   : > { %6161 = vrot.lane.b32.xlu0 %v5741_v15, %s7214_s27  ;;  %v6987_v7 = vpop.f32.mrb[71].mxu1  ;;  %v8679_v15 = vld [vmem:[#allocation12_spill] sm:$0xff] }
 0x7a7   : > { %v5817_v47 = vpop.f32.mrb[78].mxu0 }
 0x7a8   : > { %v5893_v38 = vpop.f32.mrb[72].mxu1  ;;  %6163 = vrot.lane.b32.xlu1 %v5817_v47, %s7214_s27  ;;  %v6992_v29 = vpop.f32.mrb[79].mxu0 }
 0x7a9   : > { %6165 = vrot.lane.b32.xlu0 %v5893_v38, %s7214_s27  ;;  %v6997_v20 = vpop.f32.mrb[73].mxu1  ;;  %v8680_v38 = vld [vmem:[#allocation7_spill] sm:$0xff] }
 0x7ab   : > { %v5969_v62 = vpop.f32.mrb[80].mxu0 }
 0x7ac   : > { %v6045_v11 = vpop.f32.mrb[74].mxu1  ;;  %6167 = vrot.lane.b32.xlu1 %v5969_v62, %s7214_s27  ;;  %v7002_v40 = vpop.f32.mrb[81].mxu0 }
 0x7ad   : > { %6169 = vrot.lane.b32.xlu0 %v6045_v11, %s7214_s27  ;;  %v7007_v31 = vpop.f32.mrb[75].mxu1 }
 0x7af   : > { %v6121_v55 = vpop.f32.mrb[82].mxu0 }
 0x7b0   : > { %6171 = vrot.lane.b32.xlu1 %v6121_v55, %s7214_s27  ;;  %v7012_v14 = vpop.f32.mrb[83].mxu0 }
 0x7d4   : > { %v6142_v48 = vpop.permute.xlu0 %6141 }
 0x7d5   : > { %v6190_v59 = vsel %vm6189_vm2, %v8095_v44, %v6142_v48 }
 0x7d6   : > { %v6213_v24 = vadd.f32 %v8510_v8, %v6190_v59 }
 0x7d8   : > { %6229 = vst.msk [vmem:[%s8516_s7] sm:$0xff] %vm470_vm1, %v6213_v24 }
 0x7f7   : > { %v6146_v16 = vpop.permute.xlu0 %6145 }
 0x7f8   : > { %v6192_v25 = vsel %vm6189_vm2, %v8099_v54, %v6146_v16 }
 0x7f9   : > { %v6215_v37 = vadd.f32 %v8510_v8, %v6192_v25 }
 0x7fb   : > { %6231 = vst.msk [vmem:[%s8516_s7 + $0x10] sm:$0xff] %vm470_vm1, %v6215_v37 }
 0x806   : > { %v6144_v2 = vpop.permute.xlu1 %6143 }
 0x807   : > { %v6191_v18 = vsel %vm6189_vm2, %v8097_v30, %v6144_v2 }
 0x808   : > { %v6214_v44 = vadd.f32 %v8510_v8, %v6191_v18 }
 0x80a   : > { %6230 = vst.msk [vmem:[%s8516_s7 + $0x8] sm:$0xff] %vm470_vm1, %v6214_v44  ;;  %v6148_v26 = vpop.permute.xlu1 %6147 }
 0x80b   : > { %v6193_v36 = vsel %vm6189_vm2, %v8101_v56, %v6148_v26  ;;  %v6150_v10 = vpop.permute.xlu0 %6149 }
 0x80c   : > { %v6216_v54 = vadd.f32 %v8510_v8, %v6193_v36  ;;  %v6194_v9 = vsel %vm6189_vm2, %v8103_v35, %v6150_v10 }
 0x80d   : > { %v6217_v32 = vadd.f32 %v8510_v8, %v6194_v9 }
 0x80e   : > { %6232 = vst.msk [vmem:[%s8516_s7 + $0x18] sm:$0xff] %vm470_vm1, %v6216_v54  ;;  %v6152_v30 = vpop.permute.xlu1 %6151 }
 0x80f   : > { %6233 = vst.msk [vmem:[%s8516_s7 + $0x20] sm:$0xff] %vm470_vm1, %v6217_v32  ;;  %v6195_v19 = vsel %vm6189_vm2, %v8105_v41, %v6152_v30  ;;  %v6154_v6 = vpop.permute.xlu0 %6153 }
 0x810   : > { %v6218_v56 = vadd.f32 %v8510_v8, %v6195_v19  ;;  %v6196_v49 = vsel %vm6189_vm2, %v8107_v28, %v6154_v6 }
 0x811   : > { %v6219_v35 = vadd.f32 %v8510_v8, %v6196_v49 }
 0x812   : > { %6234 = vst.msk [vmem:[%s8516_s7 + $0x28] sm:$0xff] %vm470_vm1, %v6218_v56  ;;  %v6156_v57 = vpop.permute.xlu1 %6155 }
 0x813   : > { %6235 = vst.msk [vmem:[%s8516_s7 + $0x30] sm:$0xff] %vm470_vm1, %v6219_v35  ;;  %v6197_v34 = vsel %vm6189_vm2, %v8672_v39, %v6156_v57  ;;  %v6158_v43 = vpop.permute.xlu0 %6157 }
 0x814   : > { %v6220_v41 = vadd.f32 %v8510_v8, %v6197_v34  ;;  %v6198_v46 = vsel %vm6189_vm2, %v8673_v61, %v6158_v43 }
 0x815   : > { %v6221_v28 = vadd.f32 %v8510_v8, %v6198_v46 }
 0x816   : > { %6236 = vst.msk [vmem:[%s8516_s7 + $0x38] sm:$0xff] %vm470_vm1, %v6220_v41  ;;  %v6160_v50 = vpop.permute.xlu1 %6159 }
 0x817   : > { %6237 = vst.msk [vmem:[%s8516_s7 + $0x40] sm:$0xff] %vm470_vm1, %v6221_v28  ;;  %v6199_v60 = vsel %vm6189_vm2, %v8674_v12, %v6160_v50  ;;  %v6162_v23 = vpop.permute.xlu0 %6161 }
 0x818   : > { %v6222_v1 = vadd.f32 %v8510_v8, %v6199_v60  ;;  %v6200_v4 = vsel %vm6189_vm2, %v8675_v22, %v6162_v23 }
 0x819   : > { %v6223_v52 = vadd.f32 %v8510_v8, %v6200_v4 }
 0x81a   : > { %6238 = vst.msk [vmem:[%s8516_s7 + $0x48] sm:$0xff] %vm470_vm1, %v6222_v1  ;;  %v6164_v21 = vpop.permute.xlu1 %6163 }
 0x81b   : > { %6239 = vst.msk [vmem:[%s8516_s7 + $0x50] sm:$0xff] %vm470_vm1, %v6223_v52  ;;  %v6201_v0 = vsel %vm6189_vm2, %v8676_v13, %v6164_v21  ;;  %v6166_v51 = vpop.permute.xlu0 %6165 }
 0x81c   : > { %v6224_v27 = vadd.f32 %v8510_v8, %v6201_v0  ;;  %v6202_v45 = vsel %vm6189_vm2, %v8677_v5, %v6166_v51 }
 0x81d   : > { %v6225_v53 = vadd.f32 %v8510_v8, %v6202_v45 }
 0x81e   : > { %6240 = vst.msk [vmem:[%s8516_s7 + $0x58] sm:$0xff] %vm470_vm1, %v6224_v27  ;;  %v6168_v33 = vpop.permute.xlu1 %6167 }
 0x81f   : > { %6241 = vst.msk [vmem:[%s8516_s7 + $0x60] sm:$0xff] %vm470_vm1, %v6225_v53  ;;  %v6203_v42 = vsel %vm6189_vm2, %v8678_v3, %v6168_v33  ;;  %v6170_v63 = vpop.permute.xlu0 %6169 }
 0x820   : > { %v6226_v58 = vadd.f32 %v8510_v8, %v6203_v42  ;;  %v6204_v17 = vsel %vm6189_vm2, %v8679_v15, %v6170_v63 }
 0x821   : > { %v6227_v7 = vadd.f32 %v8510_v8, %v6204_v17 }
 0x822   : > { %6242 = vst.msk [vmem:[%s8516_s7 + $0x68] sm:$0xff] %vm470_vm1, %v6226_v58  ;;  %v6172_v47 = vpop.permute.xlu1 %6171 }
 0x823   : > { %6243 = vst.msk [vmem:[%s8516_s7 + $0x70] sm:$0xff] %vm470_vm1, %v6227_v7  ;;  %v6205_v29 = vsel %vm6189_vm2, %v8680_v38, %v6172_v47 }
 0x824   : > { %v6228_v20 = vadd.f32 %v8510_v8, %v6205_v29 }
 0x826   : > { %6244 = vst.msk [vmem:[%s8516_s7 + $0x78] sm:$0xff] %vm470_vm1, %v6228_v20 }
 0x827 PF: > { %s15_s18 = sadd.s32 1, %s7204_s18  }
 0x828   : > { %p12_p4 = scmp.ge.s32.totalorder %s15_s18, 4  }
 0x82a   :  { %14 = sbr.rel (!%p12_p4) target bundleno = 1 (0x1), region = 73 }

</bundles_post_ra>
